<compile_context>
chip_gen: v5e
topology: v5e:2x2
jax: 0.10.0
libtpu: 0.0.40
codegen_flags: <defaults>
</compile_context>

<pallas_src>
import functools

import jax
import jax.numpy as jnp
from jax import lax
from jax.experimental import pallas as pl
from jax.experimental.pallas import tpu as pltpu


# ---------------------------------------------------------------------------
# Pallas kernel: both LSTM directions, chunked time loop, masked recurrence
# ---------------------------------------------------------------------------
def _bilstm_kernel(len_ref, xproj_ref, whh_ref,     # inputs
                   y_ref, hN_ref, cN_ref,           # outputs
                   h_sc, c_sc):                     # scratch (state carry)
    d = pl.program_id(0)            # direction: 0 = forward, 1 = backward
    c = pl.program_id(1)            # chunk index in processing order
    n_chunks = pl.num_programs(1)

    TC, B, G = xproj_ref.shape      # chunk_len, padded batch, 4H
    H = G // 4

    @pl.when(c == 0)
    def _init():
        h_sc[...] = jnp.zeros_like(h_sc)
        c_sc[...] = jnp.zeros_like(c_sc)

    whh = whh_ref[...]              # (H, 4H) bf16, this direction's W_hh
    lens = len_ref[...]             # (B, 1) int32 sequence lengths

    # storage-order time-block handled by this grid step
    # forward: tb = c ; backward: tb = n_chunks - 1 - c
    tb = d * (n_chunks - 1) + (1 - 2 * d) * c
    t_base = tb * TC

    def step(i, carry):
        h_prev, c_prev = carry
        # local storage-time index inside the chunk:
        # forward processes lt = 0..TC-1, backward processes lt = TC-1..0
        lt = d * (TC - 1) + (1 - 2 * d) * i

        x = xproj_ref[lt]                                   # (B, 4H) f32 (bias folded in)
        rec = jnp.dot(h_prev.astype(jnp.bfloat16), whh,
                      preferred_element_type=jnp.float32)   # (B, 4H) f32
        g = x + rec

        # PyTorch gate order: i, f, g, o (static lane slices)
        i_g = jax.nn.sigmoid(g[:, 0 * H:1 * H])
        f_g = jax.nn.sigmoid(g[:, 1 * H:2 * H])
        g_g = jnp.tanh(g[:, 2 * H:3 * H])
        o_g = jax.nn.sigmoid(g[:, 3 * H:4 * H])

        c_new = f_g * c_prev + i_g * g_g
        h_new = o_g * jnp.tanh(c_new)

        # packed-sequence semantics: freeze state / zero output past length[b]
        valid = (t_base + lt) < lens                        # (B, 1) bool
        y_ref[lt] = jnp.where(valid, h_new, 0.0)
        h_cur = jnp.where(valid, h_new, h_prev)
        c_cur = jnp.where(valid, c_new, c_prev)
        return h_cur, c_cur

    unroll = TC if TC <= 32 else 8
    h_fin, c_fin = lax.fori_loop(0, TC, step, (h_sc[...], c_sc[...]),
                                 unroll=unroll)

    h_sc[...] = h_fin
    c_sc[...] = c_fin

    @pl.when(c == n_chunks - 1)
    def _final():
        hN_ref[...] = h_fin
        cN_ref[...] = c_fin


# ---------------------------------------------------------------------------
# Wrapper: embedding lookup + hoisted input projection + Pallas recurrence
# ---------------------------------------------------------------------------
def context_encoder_forward(token_ids, lengths, params, *, chunk=64):
    """token_ids: [T, B] int32 (0-padded), lengths: [B] int32.

    Returns (token_encodings [B, T, 2H], (last_state [B, 2H], last_cell [B, 2H])),
    matching SequentialCodeEncoder.forward / ContextEncoder.forward.
    """
    embed = params["embed"]          # [V, E] f32
    w_ih = params["w_ih"]            # [2, E, 4H]   (gate order i,f,g,o stacked)
    w_hh = params["w_hh"]            # [2, H, 4H]
    bias = params["b"]               # [2, 4H]      (b_ih + b_hh)

    T, B = token_ids.shape
    H = w_hh.shape[1]

    # -- glue: embedding gather -------------------------------------------
    emb = embed[token_ids].astype(jnp.float32)               # [T, B, E]

    # -- hoisted input projection (time-parallel, bf16 MXU, f32 accumulate) -
    xproj = jnp.einsum(
        "tbe,deg->dtbg",
        emb.astype(jnp.bfloat16), w_ih.astype(jnp.bfloat16),
        preferred_element_type=jnp.float32,
    ) + bias[:, None, None, :].astype(jnp.float32)            # [2, T, B, 4H]

    # -- pad batch to a sublane multiple and time to a chunk multiple ------
    Bp = max(8, ((B + 7) // 8) * 8)
    TC = min(chunk, ((T + 7) // 8) * 8)
    TC = max(8, (TC // 8) * 8)
    Tp = ((T + TC - 1) // TC) * TC
    n_chunks = Tp // TC
    # NOTE(v7x): with 64 MiB physical VMEM keep TC * Bp * 4H * 4B (x2 buffers)
    # well under the scoped limit; the default chunk=64 is conservative.

    xproj_p = jnp.pad(xproj, ((0, 0), (0, Tp - T), (0, Bp - B), (0, 0)))
    lens_p = jnp.pad(lengths.astype(jnp.int32), (0, Bp - B)).reshape(Bp, 1)
    w_hh_bf = w_hh.astype(jnp.bfloat16)                       # [2, H, 4H] bf16

    def tmap(d, c):          # storage-order time-block for (direction, chunk)
        return d * (n_chunks - 1) + (1 - 2 * d) * c

    fused = (H % 128 == 0)
    if fused:
        # kernel writes the direction-concatenated, lane-dense [T, B, 2H] slab
        y_shape = (Tp, Bp, 2 * H)
        y_spec = pl.BlockSpec((TC, Bp, H), lambda d, c: (tmap(d, c), 0, d))
    else:
        y_shape = (2, Tp, Bp, H)
        y_spec = pl.BlockSpec((None, TC, Bp, H),
                              lambda d, c: (d, tmap(d, c), 0, 0))

    out_shapes = (
        jax.ShapeDtypeStruct(y_shape, jnp.float32),
        jax.ShapeDtypeStruct((2, Bp, H), jnp.float32),
        jax.ShapeDtypeStruct((2, Bp, H), jnp.float32),
    )

    y, hN, cN = pl.pallas_call(
        _bilstm_kernel,
        out_shape=out_shapes,
        grid_spec=pltpu.PrefetchScalarGridSpec(
            num_scalar_prefetch=0,
            grid=(2, n_chunks),
            in_specs=[
                pl.BlockSpec((Bp, 1), lambda d, c: (0, 0)),
                pl.BlockSpec((None, TC, Bp, 4 * H),
                             lambda d, c: (d, tmap(d, c), 0, 0)),
                pl.BlockSpec((None, H, 4 * H), lambda d, c: (d, 0, 0)),
            ],
            out_specs=[
                y_spec,
                pl.BlockSpec((None, Bp, H), lambda d, c: (d, 0, 0)),
                pl.BlockSpec((None, Bp, H), lambda d, c: (d, 0, 0)),
            ],
            scratch_shapes=[
                pltpu.VMEM((Bp, H), jnp.float32),   # h carry
                pltpu.VMEM((Bp, H), jnp.float32),   # c carry
            ],
        ),
        compiler_params=pltpu.CompilerParams(
            dimension_semantics=("parallel", "arbitrary")),
    )(lens_p, xproj_p, w_hh_bf)

    if fused:
        tok = y[:T, :B, :]                                   # [T, B, 2H]
    else:
        tok = jnp.concatenate([y[0], y[1]], axis=-1)[:T, :B, :]
    token_encodings = jnp.transpose(tok, (1, 0, 2))          # [B, T, 2H]
    last_state = jnp.concatenate([hN[0, :B], hN[1, :B]], axis=-1)
    last_cell = jnp.concatenate([cN[0, :B], cN[1, :B]], axis=-1)
    return token_encodings, (last_state, last_cell)


# ---------------------------------------------------------------------------
# Pure-JAX reference (same math, same bf16 matmul operands) for verification
# ---------------------------------------------------------------------------
def _reference_forward(token_ids, lengths, params):
    embed, w_ih, w_hh, bias = (params["embed"], params["w_ih"],
                               params["w_hh"], params["b"])
    T, B = token_ids.shape
    H = w_hh.shape[1]
    emb = embed[token_ids].astype(jnp.float32)
    xproj = jnp.einsum("tbe,deg->dtbg",
                       emb.astype(jnp.bfloat16), w_ih.astype(jnp.bfloat16),
                       preferred_element_type=jnp.float32
                       ) + bias[:, None, None, :].astype(jnp.float32)
    w_hh_bf = w_hh.astype(jnp.bfloat16)
    mask = (jnp.arange(T)[:, None] < lengths[None, :]
            ).astype(jnp.float32)[..., None]                  # [T, B, 1]

    def run_dir(xp, msk, whh):
        h = jnp.zeros((B, H), jnp.float32)
        c = jnp.zeros((B, H), jnp.float32)
        ys = []
        for t in range(xp.shape[0]):
            g = xp[t] + jnp.dot(h.astype(jnp.bfloat16), whh,
                                preferred_element_type=jnp.float32)
            i_g = jax.nn.sigmoid(g[:, :H])
            f_g = jax.nn.sigmoid(g[:, H:2 * H])
            g_g = jnp.tanh(g[:, 2 * H:3 * H])
            o_g = jax.nn.sigmoid(g[:, 3 * H:])
            c_new = f_g * c + i_g * g_g
            h_new = o_g * jnp.tanh(c_new)
            m = msk[t]
            ys.append(m * h_new)
            h = m * h_new + (1.0 - m) * h
            c = m * c_new + (1.0 - m) * c
        return jnp.stack(ys), h, c

    yf, hf, cf = run_dir(xproj[0], mask, w_hh_bf[0])
    yb_r, hb, cb = run_dir(xproj[1][::-1], mask[::-1], w_hh_bf[1])
    tok = jnp.transpose(jnp.concatenate([yf, yb_r[::-1]], -1), (1, 0, 2))
    return tok, (jnp.concatenate([hf, hb], -1), jnp.concatenate([cf, cb], -1))


# ---------------------------------------------------------------------------
if __name__ == "__main__":
    VOCAB = 50
    E = 64          # token_embed_size
    ENC = 256       # token_encoding_size -> H = 128 per direction (lane-dense)
    H = ENC // 2
    B = 8           # batch (number of code chunks)
    T = 16          # max sequence length

    key = jax.random.PRNGKey(0)
    k = jax.random.split(key, 6)

    def winit(kk, shape, scale=0.2):
        return (scale * jax.random.normal(kk, shape)).astype(jnp.float32)

    params = {
        "embed": winit(k[0], (VOCAB, E), 1.0),
        "w_ih": winit(k[1], (2, E, 4 * H)),   # [dir, E, 4H], gate order i,f,g,o
        "w_hh": winit(k[2], (2, H, 4 * H)),   # [dir, H, 4H]
        "b":    winit(k[3], (2, 4 * H)),      # b_ih + b_hh combined
    }

    lengths = jnp.array([16, 11, 5, 9, 3, 16, 7, 12], dtype=jnp.int32)
    token_ids = jax.random.randint(k[4], (T, B), 1, VOCAB, dtype=jnp.int32)
    pad_mask = jnp.arange(T)[:, None] < lengths[None, :]
    token_ids = jnp.where(pad_mask, token_ids, 0)

    fwd = jax.jit(functools.partial(context_encoder_forward,
                                    params=params, chunk=8))  # 2 time chunks
    enc, (last_state, last_cell) = fwd(token_ids, lengths)
    jax.block_until_ready((enc, last_state, last_cell))

    # ---- correctness check vs pure-JAX reference -------------------------
    enc_ref, (state_ref, cell_ref) = _reference_forward(token_ids, lengths, params)
    for got, ref, name in ((enc, enc_ref, "token_encodings"),
                           (last_state, state_ref, "last_state"),
                           (last_cell, cell_ref, "last_cell")):
        err = float(jnp.max(jnp.abs(got - ref)))
        assert err < 2e-3, f"{name} mismatch, max abs err={err}"

    assert enc.shape == (B, T, ENC)
    assert last_state.shape == (B, ENC)
    assert last_cell.shape == (B, ENC)

    print("KERNEL_OK")
</pallas_src>

<mosaic_0001>
module attributes {stable_mosaic.version = 11 : i64} {
  func.func @_bilstm_kernel(%arg0: i32, %arg1: i32, %arg2: memref<8x1xi32, #tpu.memory_space<vmem>>, %arg3: memref<1x8x8x512xf32, #tpu.memory_space<vmem>>, %arg4: memref<1x128x512xbf16, #tpu.memory_space<vmem>>, %arg5: memref<8x8x128xf32, #tpu.memory_space<vmem>>, %arg6: memref<1x8x128xf32, #tpu.memory_space<vmem>>, %arg7: memref<1x8x128xf32, #tpu.memory_space<vmem>>, %arg8: memref<8x128xf32, #tpu.memory_space<vmem>>, %arg9: memref<8x128xf32, #tpu.memory_space<vmem>>) attributes {dimension_semantics = [#tpu.dimension_semantics<parallel>, #tpu.dimension_semantics<arbitrary>], iteration_bounds = array<i64: 2, 2>, scalar_prefetch = 0 : i64, scratch_operands = 2 : i64, tpu.core_type = #tpu.core_type<tc>, window_params = [{pipeline_mode = #tpu.pipeline_mode<synchronous>, transform_indices = @transform_0, window_bounds = array<i64: 8, 1>}, {transform_indices = @transform_1, window_bounds = array<i64: 1, 8, 8, 512>}, {transform_indices = @transform_2, window_bounds = array<i64: 1, 128, 512>}, {transform_indices = @transform_3, window_bounds = array<i64: 8, 8, 128>}, {transform_indices = @transform_4, window_bounds = array<i64: 1, 8, 128>}, {transform_indices = @transform_5, window_bounds = array<i64: 1, 8, 128>}]} {
    %c0_i32 = arith.constant 0 : i32
    %0 = arith.cmpi eq, %arg1, %c0_i32 : i32
    %1 = arith.extui %0 : i1 to i32
    %c0_i32_0 = arith.constant 0 : i32
    %2 = arith.cmpi ne, %1, %c0_i32_0 : i32
    scf.if %2 {
      %cst_123 = arith.constant 0.000000e+00 : f32
      %443 = vector.broadcast %cst_123 : f32 to vector<8x128xf32>
      %c0_124 = arith.constant 0 : index
      %c0_125 = arith.constant 0 : index
      %444 = vector.load %arg8[%c0_124, %c0_125] : memref<8x128xf32, #tpu.memory_space<vmem>>, vector<8x128xf32>
      tpu.vector_store %arg8[%c0_124, %c0_125], %443 {strides = array<i32>} : memref<8x128xf32, #tpu.memory_space<vmem>>, vector<8x128xf32>,
      %cst_126 = arith.constant 0.000000e+00 : f32
      %445 = vector.broadcast %cst_126 : f32 to vector<8x128xf32>
      %c0_127 = arith.constant 0 : index
      %c0_128 = arith.constant 0 : index
      %446 = vector.load %arg9[%c0_127, %c0_128] : memref<8x128xf32, #tpu.memory_space<vmem>>, vector<8x128xf32>
      tpu.vector_store %arg9[%c0_127, %c0_128], %445 {strides = array<i32>} : memref<8x128xf32, #tpu.memory_space<vmem>>, vector<8x128xf32>,
    } else {
    }
    %c0 = arith.constant 0 : index
    %c0_1 = arith.constant 0 : index
    %c0_2 = arith.constant 0 : index
    %3 = vector.load %arg4[%c0, %c0_1, %c0_2] : memref<1x128x512xbf16, #tpu.memory_space<vmem>>, vector<1x128x512xbf16>
    %4 = vector.shape_cast %3 : vector<1x128x512xbf16> to vector<128x512xbf16>
    %c0_3 = arith.constant 0 : index
    %c0_4 = arith.constant 0 : index
    %5 = vector.load %arg2[%c0_3, %c0_4] : memref<8x1xi32, #tpu.memory_space<vmem>>, vector<8x1xi32>
    %c1_i32 = arith.constant 1 : i32
    %6 = arith.muli %arg0, %c1_i32 : i32
    %c2_i32 = arith.constant 2 : i32
    %7 = arith.muli %c2_i32, %arg0 : i32
    %c1_i32_5 = arith.constant 1 : i32
    %8 = arith.subi %c1_i32_5, %7 : i32
    %9 = arith.muli %8, %arg1 : i32
    %10 = arith.addi %6, %9 : i32
    %c8_i32 = arith.constant 8 : i32
    %11 = arith.muli %10, %c8_i32 : i32
    %c0_6 = arith.constant 0 : index
    %c0_7 = arith.constant 0 : index
    %12 = vector.load %arg8[%c0_6, %c0_7] : memref<8x128xf32, #tpu.memory_space<vmem>>, vector<8x128xf32>
    %c0_8 = arith.constant 0 : index
    %c0_9 = arith.constant 0 : index
    %13 = vector.load %arg9[%c0_8, %c0_9] : memref<8x128xf32, #tpu.memory_space<vmem>>, vector<8x128xf32>
    %c0_i32_10 = arith.constant 0 : i32
    %c7_i32 = arith.constant 7 : i32
    %14 = arith.muli %arg0, %c7_i32 : i32
    %c2_i32_11 = arith.constant 2 : i32
    %15 = arith.muli %c2_i32_11, %arg0 : i32
    %c1_i32_12 = arith.constant 1 : i32
    %16 = arith.subi %c1_i32_12, %15 : i32
    %17 = arith.muli %16, %c0_i32_10 : i32
    %18 = arith.addi %14, %17 : i32
    %c0_13 = arith.constant 0 : index
    %19 = arith.index_cast %18 : i32 to index
    %c0_14 = arith.constant 0 : index
    %c0_15 = arith.constant 0 : index
    %20 = vector.load %arg3[%c0_13, %19, %c0_14, %c0_15] : memref<1x8x8x512xf32, #tpu.memory_space<vmem>>, vector<1x1x8x512xf32>
    %21 = vector.shape_cast %20 : vector<1x1x8x512xf32> to vector<8x512xf32>
    %22 = arith.truncf %12 : vector<8x128xf32> to vector<8x128xbf16>
    %cst = arith.constant dense<0.000000e+00> : vector<8x512xf32>
    %23 = tpu.matmul %22, %4, %cst {dimension_numbers = #tpu.dot_dimension_numbers<[1], [0], [0], [1], [0, 0, 1, 1], [], []>} : vector<8x128xbf16>, vector<128x512xbf16>, vector<8x512xf32> -> vector<8x512xf32>
    %24 = arith.addf %21, %23 : vector<8x512xf32>
    %25 = vector.extract_strided_slice %24 {offsets = [0, 0], sizes = [8, 128], strides = [1, 1]} : vector<8x512xf32> to vector<8x128xf32>
    %26 = arith.negf %25 : vector<8x128xf32>
    %27 = math.exp %26 : vector<8x128xf32>
    %cst_16 = arith.constant 1.000000e+00 : f32
    %28 = vector.broadcast %cst_16 : f32 to vector<8x128xf32>
    %29 = arith.addf %28, %27 : vector<8x128xf32>
    %30 = arith.divf %28, %29 : vector<8x128xf32>
    %31 = vector.extract_strided_slice %24 {offsets = [0, 128], sizes = [8, 128], strides = [1, 1]} : vector<8x512xf32> to vector<8x128xf32>
    %32 = arith.negf %31 : vector<8x128xf32>
    %33 = math.exp %32 : vector<8x128xf32>
    %cst_17 = arith.constant 1.000000e+00 : f32
    %34 = vector.broadcast %cst_17 : f32 to vector<8x128xf32>
    %35 = arith.addf %34, %33 : vector<8x128xf32>
    %36 = arith.divf %34, %35 : vector<8x128xf32>
    %37 = vector.extract_strided_slice %24 {offsets = [0, 256], sizes = [8, 128], strides = [1, 1]} : vector<8x512xf32> to vector<8x128xf32>
    %38 = math.tanh %37 : vector<8x128xf32>
    %39 = vector.extract_strided_slice %24 {offsets = [0, 384], sizes = [8, 128], strides = [1, 1]} : vector<8x512xf32> to vector<8x128xf32>
    %40 = arith.negf %39 : vector<8x128xf32>
    %41 = math.exp %40 : vector<8x128xf32>
    %cst_18 = arith.constant 1.000000e+00 : f32
    %42 = vector.broadcast %cst_18 : f32 to vector<8x128xf32>
    %43 = arith.addf %42, %41 : vector<8x128xf32>
    %44 = arith.divf %42, %43 : vector<8x128xf32>
    %45 = arith.mulf %36, %13 : vector<8x128xf32>
    %46 = arith.mulf %30, %38 : vector<8x128xf32>
    %47 = arith.addf %45, %46 : vector<8x128xf32>
    %48 = math.tanh %47 : vector<8x128xf32>
    %49 = arith.mulf %44, %48 : vector<8x128xf32>
    %50 = arith.addi %11, %18 : i32
    %51 = vector.broadcast %50 : i32 to vector<8x1xi32>
    %52 = arith.cmpi slt, %51, %5 : vector<8x1xi32>
    %cst_19 = arith.constant 0.000000e+00 : f32
    %53 = vector.shape_cast %52 : vector<8x1xi1> to vector<8x1xi1>
    %54 = vector.broadcast %53 : vector<8x1xi1> to vector<8x128xi1>
    %55 = vector.broadcast %cst_19 : f32 to vector<8x128xf32>
    %56 = arith.select %54, %49, %55 : vector<8x128xi1>, vector<8x128xf32>
    %57 = arith.index_cast %18 : i32 to index
    %c0_20 = arith.constant 0 : index
    %c0_21 = arith.constant 0 : index
    %58 = vector.load %arg5[%57, %c0_20, %c0_21] : memref<8x8x128xf32, #tpu.memory_space<vmem>>, vector<1x8x128xf32>
    %59 = vector.shape_cast %58 : vector<1x8x128xf32> to vector<8x128xf32>
    %60 = vector.shape_cast %56 : vector<8x128xf32> to vector<1x8x128xf32>
    tpu.vector_store %arg5[%57, %c0_20, %c0_21], %60 {strides = array<i32>} : memref<8x8x128xf32, #tpu.memory_space<vmem>>, vector<1x8x128xf32>,
    %61 = vector.shape_cast %52 : vector<8x1xi1> to vector<8x1xi1>
    %62 = vector.broadcast %61 : vector<8x1xi1> to vector<8x128xi1>
    %63 = arith.select %62, %49, %12 : vector<8x128xi1>, vector<8x128xf32>
    %64 = vector.shape_cast %52 : vector<8x1xi1> to vector<8x1xi1>
    %65 = vector.broadcast %64 : vector<8x1xi1> to vector<8x128xi1>
    %66 = arith.select %65, %47, %13 : vector<8x128xi1>, vector<8x128xf32>
    %c1_i32_22 = arith.constant 1 : i32
    %c7_i32_23 = arith.constant 7 : i32
    %67 = arith.muli %arg0, %c7_i32_23 : i32
    %c2_i32_24 = arith.constant 2 : i32
    %68 = arith.muli %c2_i32_24, %arg0 : i32
    %c1_i32_25 = arith.constant 1 : i32
    %69 = arith.subi %c1_i32_25, %68 : i32
    %70 = arith.muli %69, %c1_i32_22 : i32
    %71 = arith.addi %67, %70 : i32
    %c0_26 = arith.constant 0 : index
    %72 = arith.index_cast %71 : i32 to index
    %c0_27 = arith.constant 0 : index
    %c0_28 = arith.constant 0 : index
    %73 = vector.load %arg3[%c0_26, %72, %c0_27, %c0_28] : memref<1x8x8x512xf32, #tpu.memory_space<vmem>>, vector<1x1x8x512xf32>
    %74 = vector.shape_cast %73 : vector<1x1x8x512xf32> to vector<8x512xf32>
    %75 = arith.truncf %63 : vector<8x128xf32> to vector<8x128xbf16>
    %cst_29 = arith.constant dense<0.000000e+00> : vector<8x512xf32>
    %76 = tpu.matmul %75, %4, %cst_29 {dimension_numbers = #tpu.dot_dimension_numbers<[1], [0], [0], [1], [0, 0, 1, 1], [], []>} : vector<8x128xbf16>, vector<128x512xbf16>, vector<8x512xf32> -> vector<8x512xf32>
    %77 = arith.addf %74, %76 : vector<8x512xf32>
    %78 = vector.extract_strided_slice %77 {offsets = [0, 0], sizes = [8, 128], strides = [1, 1]} : vector<8x512xf32> to vector<8x128xf32>
    %79 = arith.negf %78 : vector<8x128xf32>
    %80 = math.exp %79 : vector<8x128xf32>
    %cst_30 = arith.constant 1.000000e+00 : f32
    %81 = vector.broadcast %cst_30 : f32 to vector<8x128xf32>
    %82 = arith.addf %81, %80 : vector<8x128xf32>
    %83 = arith.divf %81, %82 : vector<8x128xf32>
    %84 = vector.extract_strided_slice %77 {offsets = [0, 128], sizes = [8, 128], strides = [1, 1]} : vector<8x512xf32> to vector<8x128xf32>
    %85 = arith.negf %84 : vector<8x128xf32>
    %86 = math.exp %85 : vector<8x128xf32>
    %cst_31 = arith.constant 1.000000e+00 : f32
    %87 = vector.broadcast %cst_31 : f32 to vector<8x128xf32>
    %88 = arith.addf %87, %86 : vector<8x128xf32>
    %89 = arith.divf %87, %88 : vector<8x128xf32>
    %90 = vector.extract_strided_slice %77 {offsets = [0, 256], sizes = [8, 128], strides = [1, 1]} : vector<8x512xf32> to vector<8x128xf32>
    %91 = math.tanh %90 : vector<8x128xf32>
    %92 = vector.extract_strided_slice %77 {offsets = [0, 384], sizes = [8, 128], strides = [1, 1]} : vector<8x512xf32> to vector<8x128xf32>
    %93 = arith.negf %92 : vector<8x128xf32>
    %94 = math.exp %93 : vector<8x128xf32>
    %cst_32 = arith.constant 1.000000e+00 : f32
    %95 = vector.broadcast %cst_32 : f32 to vector<8x128xf32>
    %96 = arith.addf %95, %94 : vector<8x128xf32>
    %97 = arith.divf %95, %96 : vector<8x128xf32>
    %98 = arith.mulf %89, %66 : vector<8x128xf32>
    %99 = arith.mulf %83, %91 : vector<8x128xf32>
    %100 = arith.addf %98, %99 : vector<8x128xf32>
    %101 = math.tanh %100 : vector<8x128xf32>
    %102 = arith.mulf %97, %101 : vector<8x128xf32>
    %103 = arith.addi %11, %71 : i32
    %104 = vector.broadcast %103 : i32 to vector<8x1xi32>
    %105 = arith.cmpi slt, %104, %5 : vector<8x1xi32>
    %cst_33 = arith.constant 0.000000e+00 : f32
    %106 = vector.shape_cast %105 : vector<8x1xi1> to vector<8x1xi1>
    %107 = vector.broadcast %106 : vector<8x1xi1> to vector<8x128xi1>
    %108 = vector.broadcast %cst_33 : f32 to vector<8x128xf32>
    %109 = arith.select %107, %102, %108 : vector<8x128xi1>, vector<8x128xf32>
    %110 = arith.index_cast %71 : i32 to index
    %c0_34 = arith.constant 0 : index
    %c0_35 = arith.constant 0 : index
    %111 = vector.load %arg5[%110, %c0_34, %c0_35] : memref<8x8x128xf32, #tpu.memory_space<vmem>>, vector<1x8x128xf32>
    %112 = vector.shape_cast %111 : vector<1x8x128xf32> to vector<8x128xf32>
    %113 = vector.shape_cast %109 : vector<8x128xf32> to vector<1x8x128xf32>
    tpu.vector_store %arg5[%110, %c0_34, %c0_35], %113 {strides = array<i32>} : memref<8x8x128xf32, #tpu.memory_space<vmem>>, vector<1x8x128xf32>,
    %114 = vector.shape_cast %105 : vector<8x1xi1> to vector<8x1xi1>
    %115 = vector.broadcast %114 : vector<8x1xi1> to vector<8x128xi1>
    %116 = arith.select %115, %102, %63 : vector<8x128xi1>, vector<8x128xf32>
    %117 = vector.shape_cast %105 : vector<8x1xi1> to vector<8x1xi1>
    %118 = vector.broadcast %117 : vector<8x1xi1> to vector<8x128xi1>
    %119 = arith.select %118, %100, %66 : vector<8x128xi1>, vector<8x128xf32>
    %c2_i32_36 = arith.constant 2 : i32
    %c7_i32_37 = arith.constant 7 : i32
    %120 = arith.muli %arg0, %c7_i32_37 : i32
    %c2_i32_38 = arith.constant 2 : i32
    %121 = arith.muli %c2_i32_38, %arg0 : i32
    %c1_i32_39 = arith.constant 1 : i32
    %122 = arith.subi %c1_i32_39, %121 : i32
    %123 = arith.muli %122, %c2_i32_36 : i32
    %124 = arith.addi %120, %123 : i32
    %c0_40 = arith.constant 0 : index
    %125 = arith.index_cast %124 : i32 to index
    %c0_41 = arith.constant 0 : index
    %c0_42 = arith.constant 0 : index
    %126 = vector.load %arg3[%c0_40, %125, %c0_41, %c0_42] : memref<1x8x8x512xf32, #tpu.memory_space<vmem>>, vector<1x1x8x512xf32>
    %127 = vector.shape_cast %126 : vector<1x1x8x512xf32> to vector<8x512xf32>
    %128 = arith.truncf %116 : vector<8x128xf32> to vector<8x128xbf16>
    %cst_43 = arith.constant dense<0.000000e+00> : vector<8x512xf32>
    %129 = tpu.matmul %128, %4, %cst_43 {dimension_numbers = #tpu.dot_dimension_numbers<[1], [0], [0], [1], [0, 0, 1, 1], [], []>} : vector<8x128xbf16>, vector<128x512xbf16>, vector<8x512xf32> -> vector<8x512xf32>
    %130 = arith.addf %127, %129 : vector<8x512xf32>
    %131 = vector.extract_strided_slice %130 {offsets = [0, 0], sizes = [8, 128], strides = [1, 1]} : vector<8x512xf32> to vector<8x128xf32>
    %132 = arith.negf %131 : vector<8x128xf32>
    %133 = math.exp %132 : vector<8x128xf32>
    %cst_44 = arith.constant 1.000000e+00 : f32
    %134 = vector.broadcast %cst_44 : f32 to vector<8x128xf32>
    %135 = arith.addf %134, %133 : vector<8x128xf32>
    %136 = arith.divf %134, %135 : vector<8x128xf32>
    %137 = vector.extract_strided_slice %130 {offsets = [0, 128], sizes = [8, 128], strides = [1, 1]} : vector<8x512xf32> to vector<8x128xf32>
    %138 = arith.negf %137 : vector<8x128xf32>
    %139 = math.exp %138 : vector<8x128xf32>
    %cst_45 = arith.constant 1.000000e+00 : f32
    %140 = vector.broadcast %cst_45 : f32 to vector<8x128xf32>
    %141 = arith.addf %140, %139 : vector<8x128xf32>
    %142 = arith.divf %140, %141 : vector<8x128xf32>
    %143 = vector.extract_strided_slice %130 {offsets = [0, 256], sizes = [8, 128], strides = [1, 1]} : vector<8x512xf32> to vector<8x128xf32>
    %144 = math.tanh %143 : vector<8x128xf32>
    %145 = vector.extract_strided_slice %130 {offsets = [0, 384], sizes = [8, 128], strides = [1, 1]} : vector<8x512xf32> to vector<8x128xf32>
    %146 = arith.negf %145 : vector<8x128xf32>
    %147 = math.exp %146 : vector<8x128xf32>
    %cst_46 = arith.constant 1.000000e+00 : f32
    %148 = vector.broadcast %cst_46 : f32 to vector<8x128xf32>
    %149 = arith.addf %148, %147 : vector<8x128xf32>
    %150 = arith.divf %148, %149 : vector<8x128xf32>
    %151 = arith.mulf %142, %119 : vector<8x128xf32>
    %152 = arith.mulf %136, %144 : vector<8x128xf32>
    %153 = arith.addf %151, %152 : vector<8x128xf32>
    %154 = math.tanh %153 : vector<8x128xf32>
    %155 = arith.mulf %150, %154 : vector<8x128xf32>
    %156 = arith.addi %11, %124 : i32
    %157 = vector.broadcast %156 : i32 to vector<8x1xi32>
    %158 = arith.cmpi slt, %157, %5 : vector<8x1xi32>
    %cst_47 = arith.constant 0.000000e+00 : f32
    %159 = vector.shape_cast %158 : vector<8x1xi1> to vector<8x1xi1>
    %160 = vector.broadcast %159 : vector<8x1xi1> to vector<8x128xi1>
    %161 = vector.broadcast %cst_47 : f32 to vector<8x128xf32>
    %162 = arith.select %160, %155, %161 : vector<8x128xi1>, vector<8x128xf32>
    %163 = arith.index_cast %124 : i32 to index
    %c0_48 = arith.constant 0 : index
    %c0_49 = arith.constant 0 : index
    %164 = vector.load %arg5[%163, %c0_48, %c0_49] : memref<8x8x128xf32, #tpu.memory_space<vmem>>, vector<1x8x128xf32>
    %165 = vector.shape_cast %164 : vector<1x8x128xf32> to vector<8x128xf32>
    %166 = vector.shape_cast %162 : vector<8x128xf32> to vector<1x8x128xf32>
    tpu.vector_store %arg5[%163, %c0_48, %c0_49], %166 {strides = array<i32>} : memref<8x8x128xf32, #tpu.memory_space<vmem>>, vector<1x8x128xf32>,
    %167 = vector.shape_cast %158 : vector<8x1xi1> to vector<8x1xi1>
    %168 = vector.broadcast %167 : vector<8x1xi1> to vector<8x128xi1>
    %169 = arith.select %168, %155, %116 : vector<8x128xi1>, vector<8x128xf32>
    %170 = vector.shape_cast %158 : vector<8x1xi1> to vector<8x1xi1>
    %171 = vector.broadcast %170 : vector<8x1xi1> to vector<8x128xi1>
    %172 = arith.select %171, %153, %119 : vector<8x128xi1>, vector<8x128xf32>
    %c3_i32 = arith.constant 3 : i32
    %c7_i32_50 = arith.constant 7 : i32
    %173 = arith.muli %arg0, %c7_i32_50 : i32
    %c2_i32_51 = arith.constant 2 : i32
    %174 = arith.muli %c2_i32_51, %arg0 : i32
    %c1_i32_52 = arith.constant 1 : i32
    %175 = arith.subi %c1_i32_52, %174 : i32
    %176 = arith.muli %175, %c3_i32 : i32
    %177 = arith.addi %173, %176 : i32
    %c0_53 = arith.constant 0 : index
    %178 = arith.index_cast %177 : i32 to index
    %c0_54 = arith.constant 0 : index
    %c0_55 = arith.constant 0 : index
    %179 = vector.load %arg3[%c0_53, %178, %c0_54, %c0_55] : memref<1x8x8x512xf32, #tpu.memory_space<vmem>>, vector<1x1x8x512xf32>
    %180 = vector.shape_cast %179 : vector<1x1x8x512xf32> to vector<8x512xf32>
    %181 = arith.truncf %169 : vector<8x128xf32> to vector<8x128xbf16>
    %cst_56 = arith.constant dense<0.000000e+00> : vector<8x512xf32>
    %182 = tpu.matmul %181, %4, %cst_56 {dimension_numbers = #tpu.dot_dimension_numbers<[1], [0], [0], [1], [0, 0, 1, 1], [], []>} : vector<8x128xbf16>, vector<128x512xbf16>, vector<8x512xf32> -> vector<8x512xf32>
    %183 = arith.addf %180, %182 : vector<8x512xf32>
    %184 = vector.extract_strided_slice %183 {offsets = [0, 0], sizes = [8, 128], strides = [1, 1]} : vector<8x512xf32> to vector<8x128xf32>
    %185 = arith.negf %184 : vector<8x128xf32>
    %186 = math.exp %185 : vector<8x128xf32>
    %cst_57 = arith.constant 1.000000e+00 : f32
    %187 = vector.broadcast %cst_57 : f32 to vector<8x128xf32>
    %188 = arith.addf %187, %186 : vector<8x128xf32>
    %189 = arith.divf %187, %188 : vector<8x128xf32>
    %190 = vector.extract_strided_slice %183 {offsets = [0, 128], sizes = [8, 128], strides = [1, 1]} : vector<8x512xf32> to vector<8x128xf32>
    %191 = arith.negf %190 : vector<8x128xf32>
    %192 = math.exp %191 : vector<8x128xf32>
    %cst_58 = arith.constant 1.000000e+00 : f32
    %193 = vector.broadcast %cst_58 : f32 to vector<8x128xf32>
    %194 = arith.addf %193, %192 : vector<8x128xf32>
    %195 = arith.divf %193, %194 : vector<8x128xf32>
    %196 = vector.extract_strided_slice %183 {offsets = [0, 256], sizes = [8, 128], strides = [1, 1]} : vector<8x512xf32> to vector<8x128xf32>
    %197 = math.tanh %196 : vector<8x128xf32>
    %198 = vector.extract_strided_slice %183 {offsets = [0, 384], sizes = [8, 128], strides = [1, 1]} : vector<8x512xf32> to vector<8x128xf32>
    %199 = arith.negf %198 : vector<8x128xf32>
    %200 = math.exp %199 : vector<8x128xf32>
    %cst_59 = arith.constant 1.000000e+00 : f32
    %201 = vector.broadcast %cst_59 : f32 to vector<8x128xf32>
    %202 = arith.addf %201, %200 : vector<8x128xf32>
    %203 = arith.divf %201, %202 : vector<8x128xf32>
    %204 = arith.mulf %195, %172 : vector<8x128xf32>
    %205 = arith.mulf %189, %197 : vector<8x128xf32>
    %206 = arith.addf %204, %205 : vector<8x128xf32>
    %207 = math.tanh %206 : vector<8x128xf32>
    %208 = arith.mulf %203, %207 : vector<8x128xf32>
    %209 = arith.addi %11, %177 : i32
    %210 = vector.broadcast %209 : i32 to vector<8x1xi32>
    %211 = arith.cmpi slt, %210, %5 : vector<8x1xi32>
    %cst_60 = arith.constant 0.000000e+00 : f32
    %212 = vector.shape_cast %211 : vector<8x1xi1> to vector<8x1xi1>
    %213 = vector.broadcast %212 : vector<8x1xi1> to vector<8x128xi1>
    %214 = vector.broadcast %cst_60 : f32 to vector<8x128xf32>
    %215 = arith.select %213, %208, %214 : vector<8x128xi1>, vector<8x128xf32>
    %216 = arith.index_cast %177 : i32 to index
    %c0_61 = arith.constant 0 : index
    %c0_62 = arith.constant 0 : index
    %217 = vector.load %arg5[%216, %c0_61, %c0_62] : memref<8x8x128xf32, #tpu.memory_space<vmem>>, vector<1x8x128xf32>
    %218 = vector.shape_cast %217 : vector<1x8x128xf32> to vector<8x128xf32>
    %219 = vector.shape_cast %215 : vector<8x128xf32> to vector<1x8x128xf32>
    tpu.vector_store %arg5[%216, %c0_61, %c0_62], %219 {strides = array<i32>} : memref<8x8x128xf32, #tpu.memory_space<vmem>>, vector<1x8x128xf32>,
    %220 = vector.shape_cast %211 : vector<8x1xi1> to vector<8x1xi1>
    %221 = vector.broadcast %220 : vector<8x1xi1> to vector<8x128xi1>
    %222 = arith.select %221, %208, %169 : vector<8x128xi1>, vector<8x128xf32>
    %223 = vector.shape_cast %211 : vector<8x1xi1> to vector<8x1xi1>
    %224 = vector.broadcast %223 : vector<8x1xi1> to vector<8x128xi1>
    %225 = arith.select %224, %206, %172 : vector<8x128xi1>, vector<8x128xf32>
    %c4_i32 = arith.constant 4 : i32
    %c7_i32_63 = arith.constant 7 : i32
    %226 = arith.muli %arg0, %c7_i32_63 : i32
    %c2_i32_64 = arith.constant 2 : i32
    %227 = arith.muli %c2_i32_64, %arg0 : i32
    %c1_i32_65 = arith.constant 1 : i32
    %228 = arith.subi %c1_i32_65, %227 : i32
    %229 = arith.muli %228, %c4_i32 : i32
    %230 = arith.addi %226, %229 : i32
    %c0_66 = arith.constant 0 : index
    %231 = arith.index_cast %230 : i32 to index
    %c0_67 = arith.constant 0 : index
    %c0_68 = arith.constant 0 : index
    %232 = vector.load %arg3[%c0_66, %231, %c0_67, %c0_68] : memref<1x8x8x512xf32, #tpu.memory_space<vmem>>, vector<1x1x8x512xf32>
    %233 = vector.shape_cast %232 : vector<1x1x8x512xf32> to vector<8x512xf32>
    %234 = arith.truncf %222 : vector<8x128xf32> to vector<8x128xbf16>
    %cst_69 = arith.constant dense<0.000000e+00> : vector<8x512xf32>
    %235 = tpu.matmul %234, %4, %cst_69 {dimension_numbers = #tpu.dot_dimension_numbers<[1], [0], [0], [1], [0, 0, 1, 1], [], []>} : vector<8x128xbf16>, vector<128x512xbf16>, vector<8x512xf32> -> vector<8x512xf32>
    %236 = arith.addf %233, %235 : vector<8x512xf32>
    %237 = vector.extract_strided_slice %236 {offsets = [0, 0], sizes = [8, 128], strides = [1, 1]} : vector<8x512xf32> to vector<8x128xf32>
    %238 = arith.negf %237 : vector<8x128xf32>
    %239 = math.exp %238 : vector<8x128xf32>
    %cst_70 = arith.constant 1.000000e+00 : f32
    %240 = vector.broadcast %cst_70 : f32 to vector<8x128xf32>
    %241 = arith.addf %240, %239 : vector<8x128xf32>
    %242 = arith.divf %240, %241 : vector<8x128xf32>
    %243 = vector.extract_strided_slice %236 {offsets = [0, 128], sizes = [8, 128], strides = [1, 1]} : vector<8x512xf32> to vector<8x128xf32>
    %244 = arith.negf %243 : vector<8x128xf32>
    %245 = math.exp %244 : vector<8x128xf32>
    %cst_71 = arith.constant 1.000000e+00 : f32
    %246 = vector.broadcast %cst_71 : f32 to vector<8x128xf32>
    %247 = arith.addf %246, %245 : vector<8x128xf32>
    %248 = arith.divf %246, %247 : vector<8x128xf32>
    %249 = vector.extract_strided_slice %236 {offsets = [0, 256], sizes = [8, 128], strides = [1, 1]} : vector<8x512xf32> to vector<8x128xf32>
    %250 = math.tanh %249 : vector<8x128xf32>
    %251 = vector.extract_strided_slice %236 {offsets = [0, 384], sizes = [8, 128], strides = [1, 1]} : vector<8x512xf32> to vector<8x128xf32>
    %252 = arith.negf %251 : vector<8x128xf32>
    %253 = math.exp %252 : vector<8x128xf32>
    %cst_72 = arith.constant 1.000000e+00 : f32
    %254 = vector.broadcast %cst_72 : f32 to vector<8x128xf32>
    %255 = arith.addf %254, %253 : vector<8x128xf32>
    %256 = arith.divf %254, %255 : vector<8x128xf32>
    %257 = arith.mulf %248, %225 : vector<8x128xf32>
    %258 = arith.mulf %242, %250 : vector<8x128xf32>
    %259 = arith.addf %257, %258 : vector<8x128xf32>
    %260 = math.tanh %259 : vector<8x128xf32>
    %261 = arith.mulf %256, %260 : vector<8x128xf32>
    %262 = arith.addi %11, %230 : i32
    %263 = vector.broadcast %262 : i32 to vector<8x1xi32>
    %264 = arith.cmpi slt, %263, %5 : vector<8x1xi32>
    %cst_73 = arith.constant 0.000000e+00 : f32
    %265 = vector.shape_cast %264 : vector<8x1xi1> to vector<8x1xi1>
    %266 = vector.broadcast %265 : vector<8x1xi1> to vector<8x128xi1>
    %267 = vector.broadcast %cst_73 : f32 to vector<8x128xf32>
    %268 = arith.select %266, %261, %267 : vector<8x128xi1>, vector<8x128xf32>
    %269 = arith.index_cast %230 : i32 to index
    %c0_74 = arith.constant 0 : index
    %c0_75 = arith.constant 0 : index
    %270 = vector.load %arg5[%269, %c0_74, %c0_75] : memref<8x8x128xf32, #tpu.memory_space<vmem>>, vector<1x8x128xf32>
    %271 = vector.shape_cast %270 : vector<1x8x128xf32> to vector<8x128xf32>
    %272 = vector.shape_cast %268 : vector<8x128xf32> to vector<1x8x128xf32>
    tpu.vector_store %arg5[%269, %c0_74, %c0_75], %272 {strides = array<i32>} : memref<8x8x128xf32, #tpu.memory_space<vmem>>, vector<1x8x128xf32>,
    %273 = vector.shape_cast %264 : vector<8x1xi1> to vector<8x1xi1>
    %274 = vector.broadcast %273 : vector<8x1xi1> to vector<8x128xi1>
    %275 = arith.select %274, %261, %222 : vector<8x128xi1>, vector<8x128xf32>
    %276 = vector.shape_cast %264 : vector<8x1xi1> to vector<8x1xi1>
    %277 = vector.broadcast %276 : vector<8x1xi1> to vector<8x128xi1>
    %278 = arith.select %277, %259, %225 : vector<8x128xi1>, vector<8x128xf32>
    %c5_i32 = arith.constant 5 : i32
    %c7_i32_76 = arith.constant 7 : i32
    %279 = arith.muli %arg0, %c7_i32_76 : i32
    %c2_i32_77 = arith.constant 2 : i32
    %280 = arith.muli %c2_i32_77, %arg0 : i32
    %c1_i32_78 = arith.constant 1 : i32
    %281 = arith.subi %c1_i32_78, %280 : i32
    %282 = arith.muli %281, %c5_i32 : i32
    %283 = arith.addi %279, %282 : i32
    %c0_79 = arith.constant 0 : index
    %284 = arith.index_cast %283 : i32 to index
    %c0_80 = arith.constant 0 : index
    %c0_81 = arith.constant 0 : index
    %285 = vector.load %arg3[%c0_79, %284, %c0_80, %c0_81] : memref<1x8x8x512xf32, #tpu.memory_space<vmem>>, vector<1x1x8x512xf32>
    %286 = vector.shape_cast %285 : vector<1x1x8x512xf32> to vector<8x512xf32>
    %287 = arith.truncf %275 : vector<8x128xf32> to vector<8x128xbf16>
    %cst_82 = arith.constant dense<0.000000e+00> : vector<8x512xf32>
    %288 = tpu.matmul %287, %4, %cst_82 {dimension_numbers = #tpu.dot_dimension_numbers<[1], [0], [0], [1], [0, 0, 1, 1], [], []>} : vector<8x128xbf16>, vector<128x512xbf16>, vector<8x512xf32> -> vector<8x512xf32>
    %289 = arith.addf %286, %288 : vector<8x512xf32>
    %290 = vector.extract_strided_slice %289 {offsets = [0, 0], sizes = [8, 128], strides = [1, 1]} : vector<8x512xf32> to vector<8x128xf32>
    %291 = arith.negf %290 : vector<8x128xf32>
    %292 = math.exp %291 : vector<8x128xf32>
    %cst_83 = arith.constant 1.000000e+00 : f32
    %293 = vector.broadcast %cst_83 : f32 to vector<8x128xf32>
    %294 = arith.addf %293, %292 : vector<8x128xf32>
    %295 = arith.divf %293, %294 : vector<8x128xf32>
    %296 = vector.extract_strided_slice %289 {offsets = [0, 128], sizes = [8, 128], strides = [1, 1]} : vector<8x512xf32> to vector<8x128xf32>
    %297 = arith.negf %296 : vector<8x128xf32>
    %298 = math.exp %297 : vector<8x128xf32>
    %cst_84 = arith.constant 1.000000e+00 : f32
    %299 = vector.broadcast %cst_84 : f32 to vector<8x128xf32>
    %300 = arith.addf %299, %298 : vector<8x128xf32>
    %301 = arith.divf %299, %300 : vector<8x128xf32>
    %302 = vector.extract_strided_slice %289 {offsets = [0, 256], sizes = [8, 128], strides = [1, 1]} : vector<8x512xf32> to vector<8x128xf32>
    %303 = math.tanh %302 : vector<8x128xf32>
    %304 = vector.extract_strided_slice %289 {offsets = [0, 384], sizes = [8, 128], strides = [1, 1]} : vector<8x512xf32> to vector<8x128xf32>
    %305 = arith.negf %304 : vector<8x128xf32>
    %306 = math.exp %305 : vector<8x128xf32>
    %cst_85 = arith.constant 1.000000e+00 : f32
    %307 = vector.broadcast %cst_85 : f32 to vector<8x128xf32>
    %308 = arith.addf %307, %306 : vector<8x128xf32>
    %309 = arith.divf %307, %308 : vector<8x128xf32>
    %310 = arith.mulf %301, %278 : vector<8x128xf32>
    %311 = arith.mulf %295, %303 : vector<8x128xf32>
    %312 = arith.addf %310, %311 : vector<8x128xf32>
    %313 = math.tanh %312 : vector<8x128xf32>
    %314 = arith.mulf %309, %313 : vector<8x128xf32>
    %315 = arith.addi %11, %283 : i32
    %316 = vector.broadcast %315 : i32 to vector<8x1xi32>
    %317 = arith.cmpi slt, %316, %5 : vector<8x1xi32>
    %cst_86 = arith.constant 0.000000e+00 : f32
    %318 = vector.shape_cast %317 : vector<8x1xi1> to vector<8x1xi1>
    %319 = vector.broadcast %318 : vector<8x1xi1> to vector<8x128xi1>
    %320 = vector.broadcast %cst_86 : f32 to vector<8x128xf32>
    %321 = arith.select %319, %314, %320 : vector<8x128xi1>, vector<8x128xf32>
    %322 = arith.index_cast %283 : i32 to index
    %c0_87 = arith.constant 0 : index
    %c0_88 = arith.constant 0 : index
    %323 = vector.load %arg5[%322, %c0_87, %c0_88] : memref<8x8x128xf32, #tpu.memory_space<vmem>>, vector<1x8x128xf32>
    %324 = vector.shape_cast %323 : vector<1x8x128xf32> to vector<8x128xf32>
    %325 = vector.shape_cast %321 : vector<8x128xf32> to vector<1x8x128xf32>
    tpu.vector_store %arg5[%322, %c0_87, %c0_88], %325 {strides = array<i32>} : memref<8x8x128xf32, #tpu.memory_space<vmem>>, vector<1x8x128xf32>,
    %326 = vector.shape_cast %317 : vector<8x1xi1> to vector<8x1xi1>
    %327 = vector.broadcast %326 : vector<8x1xi1> to vector<8x128xi1>
    %328 = arith.select %327, %314, %275 : vector<8x128xi1>, vector<8x128xf32>
    %329 = vector.shape_cast %317 : vector<8x1xi1> to vector<8x1xi1>
    %330 = vector.broadcast %329 : vector<8x1xi1> to vector<8x128xi1>
    %331 = arith.select %330, %312, %278 : vector<8x128xi1>, vector<8x128xf32>
    %c6_i32 = arith.constant 6 : i32
    %c7_i32_89 = arith.constant 7 : i32
    %332 = arith.muli %arg0, %c7_i32_89 : i32
    %c2_i32_90 = arith.constant 2 : i32
    %333 = arith.muli %c2_i32_90, %arg0 : i32
    %c1_i32_91 = arith.constant 1 : i32
    %334 = arith.subi %c1_i32_91, %333 : i32
    %335 = arith.muli %334, %c6_i32 : i32
    %336 = arith.addi %332, %335 : i32
    %c0_92 = arith.constant 0 : index
    %337 = arith.index_cast %336 : i32 to index
    %c0_93 = arith.constant 0 : index
    %c0_94 = arith.constant 0 : index
    %338 = vector.load %arg3[%c0_92, %337, %c0_93, %c0_94] : memref<1x8x8x512xf32, #tpu.memory_space<vmem>>, vector<1x1x8x512xf32>
    %339 = vector.shape_cast %338 : vector<1x1x8x512xf32> to vector<8x512xf32>
    %340 = arith.truncf %328 : vector<8x128xf32> to vector<8x128xbf16>
    %cst_95 = arith.constant dense<0.000000e+00> : vector<8x512xf32>
    %341 = tpu.matmul %340, %4, %cst_95 {dimension_numbers = #tpu.dot_dimension_numbers<[1], [0], [0], [1], [0, 0, 1, 1], [], []>} : vector<8x128xbf16>, vector<128x512xbf16>, vector<8x512xf32> -> vector<8x512xf32>
    %342 = arith.addf %339, %341 : vector<8x512xf32>
    %343 = vector.extract_strided_slice %342 {offsets = [0, 0], sizes = [8, 128], strides = [1, 1]} : vector<8x512xf32> to vector<8x128xf32>
    %344 = arith.negf %343 : vector<8x128xf32>
    %345 = math.exp %344 : vector<8x128xf32>
    %cst_96 = arith.constant 1.000000e+00 : f32
    %346 = vector.broadcast %cst_96 : f32 to vector<8x128xf32>
    %347 = arith.addf %346, %345 : vector<8x128xf32>
    %348 = arith.divf %346, %347 : vector<8x128xf32>
    %349 = vector.extract_strided_slice %342 {offsets = [0, 128], sizes = [8, 128], strides = [1, 1]} : vector<8x512xf32> to vector<8x128xf32>
    %350 = arith.negf %349 : vector<8x128xf32>
    %351 = math.exp %350 : vector<8x128xf32>
    %cst_97 = arith.constant 1.000000e+00 : f32
    %352 = vector.broadcast %cst_97 : f32 to vector<8x128xf32>
    %353 = arith.addf %352, %351 : vector<8x128xf32>
    %354 = arith.divf %352, %353 : vector<8x128xf32>
    %355 = vector.extract_strided_slice %342 {offsets = [0, 256], sizes = [8, 128], strides = [1, 1]} : vector<8x512xf32> to vector<8x128xf32>
    %356 = math.tanh %355 : vector<8x128xf32>
    %357 = vector.extract_strided_slice %342 {offsets = [0, 384], sizes = [8, 128], strides = [1, 1]} : vector<8x512xf32> to vector<8x128xf32>
    %358 = arith.negf %357 : vector<8x128xf32>
    %359 = math.exp %358 : vector<8x128xf32>
    %cst_98 = arith.constant 1.000000e+00 : f32
    %360 = vector.broadcast %cst_98 : f32 to vector<8x128xf32>
    %361 = arith.addf %360, %359 : vector<8x128xf32>
    %362 = arith.divf %360, %361 : vector<8x128xf32>
    %363 = arith.mulf %354, %331 : vector<8x128xf32>
    %364 = arith.mulf %348, %356 : vector<8x128xf32>
    %365 = arith.addf %363, %364 : vector<8x128xf32>
    %366 = math.tanh %365 : vector<8x128xf32>
    %367 = arith.mulf %362, %366 : vector<8x128xf32>
    %368 = arith.addi %11, %336 : i32
    %369 = vector.broadcast %368 : i32 to vector<8x1xi32>
    %370 = arith.cmpi slt, %369, %5 : vector<8x1xi32>
    %cst_99 = arith.constant 0.000000e+00 : f32
    %371 = vector.shape_cast %370 : vector<8x1xi1> to vector<8x1xi1>
    %372 = vector.broadcast %371 : vector<8x1xi1> to vector<8x128xi1>
    %373 = vector.broadcast %cst_99 : f32 to vector<8x128xf32>
    %374 = arith.select %372, %367, %373 : vector<8x128xi1>, vector<8x128xf32>
    %375 = arith.index_cast %336 : i32 to index
    %c0_100 = arith.constant 0 : index
    %c0_101 = arith.constant 0 : index
    %376 = vector.load %arg5[%375, %c0_100, %c0_101] : memref<8x8x128xf32, #tpu.memory_space<vmem>>, vector<1x8x128xf32>
    %377 = vector.shape_cast %376 : vector<1x8x128xf32> to vector<8x128xf32>
    %378 = vector.shape_cast %374 : vector<8x128xf32> to vector<1x8x128xf32>
    tpu.vector_store %arg5[%375, %c0_100, %c0_101], %378 {strides = array<i32>} : memref<8x8x128xf32, #tpu.memory_space<vmem>>, vector<1x8x128xf32>,
    %379 = vector.shape_cast %370 : vector<8x1xi1> to vector<8x1xi1>
    %380 = vector.broadcast %379 : vector<8x1xi1> to vector<8x128xi1>
    %381 = arith.select %380, %367, %328 : vector<8x128xi1>, vector<8x128xf32>
    %382 = vector.shape_cast %370 : vector<8x1xi1> to vector<8x1xi1>
    %383 = vector.broadcast %382 : vector<8x1xi1> to vector<8x128xi1>
    %384 = arith.select %383, %365, %331 : vector<8x128xi1>, vector<8x128xf32>
    %c7_i32_102 = arith.constant 7 : i32
    %c7_i32_103 = arith.constant 7 : i32
    %385 = arith.muli %arg0, %c7_i32_103 : i32
    %c2_i32_104 = arith.constant 2 : i32
    %386 = arith.muli %c2_i32_104, %arg0 : i32
    %c1_i32_105 = arith.constant 1 : i32
    %387 = arith.subi %c1_i32_105, %386 : i32
    %388 = arith.muli %387, %c7_i32_102 : i32
    %389 = arith.addi %385, %388 : i32
    %c0_106 = arith.constant 0 : index
    %390 = arith.index_cast %389 : i32 to index
    %c0_107 = arith.constant 0 : index
    %c0_108 = arith.constant 0 : index
    %391 = vector.load %arg3[%c0_106, %390, %c0_107, %c0_108] : memref<1x8x8x512xf32, #tpu.memory_space<vmem>>, vector<1x1x8x512xf32>
    %392 = vector.shape_cast %391 : vector<1x1x8x512xf32> to vector<8x512xf32>
    %393 = arith.truncf %381 : vector<8x128xf32> to vector<8x128xbf16>
    %cst_109 = arith.constant dense<0.000000e+00> : vector<8x512xf32>
    %394 = tpu.matmul %393, %4, %cst_109 {dimension_numbers = #tpu.dot_dimension_numbers<[1], [0], [0], [1], [0, 0, 1, 1], [], []>} : vector<8x128xbf16>, vector<128x512xbf16>, vector<8x512xf32> -> vector<8x512xf32>
    %395 = arith.addf %392, %394 : vector<8x512xf32>
    %396 = vector.extract_strided_slice %395 {offsets = [0, 0], sizes = [8, 128], strides = [1, 1]} : vector<8x512xf32> to vector<8x128xf32>
    %397 = arith.negf %396 : vector<8x128xf32>
    %398 = math.exp %397 : vector<8x128xf32>
    %cst_110 = arith.constant 1.000000e+00 : f32
    %399 = vector.broadcast %cst_110 : f32 to vector<8x128xf32>
    %400 = arith.addf %399, %398 : vector<8x128xf32>
    %401 = arith.divf %399, %400 : vector<8x128xf32>
    %402 = vector.extract_strided_slice %395 {offsets = [0, 128], sizes = [8, 128], strides = [1, 1]} : vector<8x512xf32> to vector<8x128xf32>
    %403 = arith.negf %402 : vector<8x128xf32>
    %404 = math.exp %403 : vector<8x128xf32>
    %cst_111 = arith.constant 1.000000e+00 : f32
    %405 = vector.broadcast %cst_111 : f32 to vector<8x128xf32>
    %406 = arith.addf %405, %404 : vector<8x128xf32>
    %407 = arith.divf %405, %406 : vector<8x128xf32>
    %408 = vector.extract_strided_slice %395 {offsets = [0, 256], sizes = [8, 128], strides = [1, 1]} : vector<8x512xf32> to vector<8x128xf32>
    %409 = math.tanh %408 : vector<8x128xf32>
    %410 = vector.extract_strided_slice %395 {offsets = [0, 384], sizes = [8, 128], strides = [1, 1]} : vector<8x512xf32> to vector<8x128xf32>
    %411 = arith.negf %410 : vector<8x128xf32>
    %412 = math.exp %411 : vector<8x128xf32>
    %cst_112 = arith.constant 1.000000e+00 : f32
    %413 = vector.broadcast %cst_112 : f32 to vector<8x128xf32>
    %414 = arith.addf %413, %412 : vector<8x128xf32>
    %415 = arith.divf %413, %414 : vector<8x128xf32>
    %416 = arith.mulf %407, %384 : vector<8x128xf32>
    %417 = arith.mulf %401, %409 : vector<8x128xf32>
    %418 = arith.addf %416, %417 : vector<8x128xf32>
    %419 = math.tanh %418 : vector<8x128xf32>
    %420 = arith.mulf %415, %419 : vector<8x128xf32>
    %421 = arith.addi %11, %389 : i32
    %422 = vector.broadcast %421 : i32 to vector<8x1xi32>
    %423 = arith.cmpi slt, %422, %5 : vector<8x1xi32>
    %cst_113 = arith.constant 0.000000e+00 : f32
    %424 = vector.shape_cast %423 : vector<8x1xi1> to vector<8x1xi1>
    %425 = vector.broadcast %424 : vector<8x1xi1> to vector<8x128xi1>
    %426 = vector.broadcast %cst_113 : f32 to vector<8x128xf32>
    %427 = arith.select %425, %420, %426 : vector<8x128xi1>, vector<8x128xf32>
    %428 = arith.index_cast %389 : i32 to index
    %c0_114 = arith.constant 0 : index
    %c0_115 = arith.constant 0 : index
    %429 = vector.load %arg5[%428, %c0_114, %c0_115] : memref<8x8x128xf32, #tpu.memory_space<vmem>>, vector<1x8x128xf32>
    %430 = vector.shape_cast %429 : vector<1x8x128xf32> to vector<8x128xf32>
    %431 = vector.shape_cast %427 : vector<8x128xf32> to vector<1x8x128xf32>
    tpu.vector_store %arg5[%428, %c0_114, %c0_115], %431 {strides = array<i32>} : memref<8x8x128xf32, #tpu.memory_space<vmem>>, vector<1x8x128xf32>,
    %432 = vector.shape_cast %423 : vector<8x1xi1> to vector<8x1xi1>
    %433 = vector.broadcast %432 : vector<8x1xi1> to vector<8x128xi1>
    %434 = arith.select %433, %420, %381 : vector<8x128xi1>, vector<8x128xf32>
    %435 = vector.shape_cast %423 : vector<8x1xi1> to vector<8x1xi1>
    %436 = vector.broadcast %435 : vector<8x1xi1> to vector<8x128xi1>
    %437 = arith.select %436, %418, %384 : vector<8x128xi1>, vector<8x128xf32>
    %c8_i32_116 = arith.constant 8 : i32
    %c0_117 = arith.constant 0 : index
    %c0_118 = arith.constant 0 : index
    %438 = vector.load %arg8[%c0_117, %c0_118] : memref<8x128xf32, #tpu.memory_space<vmem>>, vector<8x128xf32>
    tpu.vector_store %arg8[%c0_117, %c0_118], %434 {strides = array<i32>} : memref<8x128xf32, #tpu.memory_space<vmem>>, vector<8x128xf32>,
    %c0_119 = arith.constant 0 : index
    %c0_120 = arith.constant 0 : index
    %439 = vector.load %arg9[%c0_119, %c0_120] : memref<8x128xf32, #tpu.memory_space<vmem>>, vector<8x128xf32>
    tpu.vector_store %arg9[%c0_119, %c0_120], %437 {strides = array<i32>} : memref<8x128xf32, #tpu.memory_space<vmem>>, vector<8x128xf32>,
    %c1_i32_121 = arith.constant 1 : i32
    %440 = arith.cmpi eq, %arg1, %c1_i32_121 : i32
    %441 = arith.extui %440 : i1 to i32
    %c0_i32_122 = arith.constant 0 : i32
    %442 = arith.cmpi ne, %441, %c0_i32_122 : i32
    scf.if %442 {
      %c0_123 = arith.constant 0 : index
      %c0_124 = arith.constant 0 : index
      %c0_125 = arith.constant 0 : index
      %443 = vector.load %arg6[%c0_123, %c0_124, %c0_125] : memref<1x8x128xf32, #tpu.memory_space<vmem>>, vector<1x8x128xf32>
      %444 = vector.shape_cast %443 : vector<1x8x128xf32> to vector<8x128xf32>
      %445 = vector.shape_cast %434 : vector<8x128xf32> to vector<1x8x128xf32>
      tpu.vector_store %arg6[%c0_123, %c0_124, %c0_125], %445 {strides = array<i32>} : memref<1x8x128xf32, #tpu.memory_space<vmem>>, vector<1x8x128xf32>,
      %c0_126 = arith.constant 0 : index
      %c0_127 = arith.constant 0 : index
      %c0_128 = arith.constant 0 : index
      %446 = vector.load %arg7[%c0_126, %c0_127, %c0_128] : memref<1x8x128xf32, #tpu.memory_space<vmem>>, vector<1x8x128xf32>
      %447 = vector.shape_cast %446 : vector<1x8x128xf32> to vector<8x128xf32>
      %448 = vector.shape_cast %437 : vector<8x128xf32> to vector<1x8x128xf32>
      tpu.vector_store %arg7[%c0_126, %c0_127, %c0_128], %448 {strides = array<i32>} : memref<1x8x128xf32, #tpu.memory_space<vmem>>, vector<1x8x128xf32>,
    } else {
    }
    return
  }
  func.func @transform_0(%arg0: i32, %arg1: i32) -> (i32, i32) {
    %c0_i32 = arith.constant 0 : i32
    %c0_i32_0 = arith.constant 0 : i32
    %c0_i32_1 = arith.constant 0 : i32
    return %c0_i32, %c0_i32_0 : i32, i32
  }
  func.func @transform_1(%arg0: i32, %arg1: i32) -> (i32, i32, i32, i32) {
    %c1_i32 = arith.constant 1 : i32
    %0 = arith.muli %arg0, %c1_i32 : i32
    %c2_i32 = arith.constant 2 : i32
    %1 = arith.muli %c2_i32, %arg0 : i32
    %c1_i32_0 = arith.constant 1 : i32
    %2 = arith.subi %c1_i32_0, %1 : i32
    %3 = arith.muli %2, %arg1 : i32
    %4 = arith.addi %0, %3 : i32
    %c0_i32 = arith.constant 0 : i32
    %c0_i32_1 = arith.constant 0 : i32
    %c0_i32_2 = arith.constant 0 : i32
    return %arg0, %4, %c0_i32, %c0_i32_1 : i32, i32, i32, i32
  }
  func.func @transform_2(%arg0: i32, %arg1: i32) -> (i32, i32, i32) {
    %c0_i32 = arith.constant 0 : i32
    %c0_i32_0 = arith.constant 0 : i32
    %c0_i32_1 = arith.constant 0 : i32
    return %arg0, %c0_i32, %c0_i32_0 : i32, i32, i32
  }
  func.func @transform_3(%arg0: i32, %arg1: i32) -> (i32, i32, i32) {
    %c1_i32 = arith.constant 1 : i32
    %0 = arith.muli %arg0, %c1_i32 : i32
    %c2_i32 = arith.constant 2 : i32
    %1 = arith.muli %c2_i32, %arg0 : i32
    %c1_i32_0 = arith.constant 1 : i32
    %2 = arith.subi %c1_i32_0, %1 : i32
    %3 = arith.muli %2, %arg1 : i32
    %4 = arith.addi %0, %3 : i32
    %c0_i32 = arith.constant 0 : i32
    %c0_i32_1 = arith.constant 0 : i32
    return %4, %c0_i32, %arg0 : i32, i32, i32
  }
  func.func @transform_4(%arg0: i32, %arg1: i32) -> (i32, i32, i32) {
    %c0_i32 = arith.constant 0 : i32
    %c0_i32_0 = arith.constant 0 : i32
    %c0_i32_1 = arith.constant 0 : i32
    return %arg0, %c0_i32, %c0_i32_0 : i32, i32, i32
  }
  func.func @transform_5(%arg0: i32, %arg1: i32) -> (i32, i32, i32) {
    %c0_i32 = arith.constant 0 : i32
    %c0_i32_0 = arith.constant 0 : i32
    %c0_i32_1 = arith.constant 0 : i32
    return %arg0, %c0_i32, %c0_i32_0 : i32, i32, i32
  }
}

</mosaic_0001>

<bundles_post_ra>
// kernel: context_encoder_forward.1
= control target key start
LH: loop header
LB: loop body
LE: loop exit
PB: predicated region body
PF: predicated region fallthrough
CT: control target
= control target key end

     0   :  { %s3255_s0 = inlined_call_operand.vmem [shape: s32[8,1], index: 0, kind: input, shape index: {}]   ;;  %s3256_s1 = inlined_call_operand.vmem [shape: f32[2,16,8,512], index: 1, kind: input, shape index: {}]   ;;  %s3257_s2 = inlined_call_operand.vmem [shape: bf16[2,128,512], index: 2, kind: input, shape index: {}]   ;;  %s3258_s3 = inlined_call_operand.vmem [shape: f32[16,8,256], index: 3, kind: output, shape index: {0}]   ;;  %s3259_s4 = inlined_call_operand.vmem [shape: f32[2,8,128], index: 4, kind: output, shape index: {1}]   ;;  %s3260_s5 = inlined_call_operand.vmem [shape: f32[2,8,128], index: 5, kind: output, shape index: {2}]  }
   0x1   :  { %3267 = sst [smem:[#allocation12_spill]] %s3258_s3 }
   0x2   :  { %s2515_s18 = smov 0   ;;  %s2517_s19 = smov 0  }
   0x3   :  { %s2519_s20 = smov 0   ;;  %s2521_s21 = smov 0  }
   0x4   :  { %s2523_s22 = smov 0   ;;  %s2525_s23 = smov 0  }
   0x5   :  { %s2527_s24 = smov 0  }
   0x6 LB: > { %3268 = sst [smem:[#allocation5_spill]] %s2461_s19  ;;  %s25_s25 = sadd.s32 1, %s2473_s22  ;;  %s2481_s24 = sphi %s2527_s24, %s16_s24   ;;  %s2477_s23 = sphi %s2525_s23, %s3283_s23   ;;  %s2473_s22 = sphi %s2523_s22, %s3282_s22   ;;  %s2469_s21 = sphi %s2521_s21, %s3281_s21   ;;  %s2465_s20 = sphi %s2519_s20, %s3280_s20   ;;  %s2461_s19 = sphi %s2517_s19, %s3279_s19   ;;  %s2457_s18 = sphi %s2515_s18, %s3278_s18  }
   0x7   : > { %3269 = sst [smem:[#allocation6_spill]] %s2473_s22  ;;  %p26_p0 = scmp.ge.s32.totalorder %s25_s25, 2 }
   0x8   : > { %3270 = sst [smem:[#allocation7_spill]] %s2477_s23  ;;  %s28_s26 = sadd.s32 1, %s2477_s23 }
   0x9   : > { %3271 = sst [smem:[#allocation8_spill]] %s2481_s24  ;;  %s1987_s27 = sadd.s32 4294967295, %s2481_s24  }
   0xa   : > { %s1991_s28 = sshll.u32 %s2477_s23, 1  ;;  %s3285_s25 = smov (%p26_p0, %s25_s25), 0 }
   0xb   : > { %3272 = sst [smem:[#allocation9_spill]] %s3285_s25  ;;  %s3287_s26 = smov (!%p26_p0, %s28_s26), %s2477_s23 }
   0xc   : > { %s116_s29 = ssub.s32 1, %s1991_s28  ;;  %p138_p1 = scmp.ne.s32.totalorder %s2461_s19, %s2457_s18 }
   0xd   : > { %p30_p2 = scmp.ge.s32.totalorder %s3287_s26, 2  ;;  %s117_s30 = smul.u32 %s2473_s22, %s116_s29 }
   0xe   : > { %p139_p3 = scmp.eq.s32.totalorder %s1987_s27, 3  ;;  %p1995_p5 = scmp.ge.s32.totalorder %s2481_s24, 1 }
   0xf   : > { %s3289_s26 = smov (%p30_p2, %s3287_s26), 0  ;;  %p248_p6 = scmp.lt.s32.totalorder %s2481_s24, 5 }
  0x10   : > { %3273 = sst [smem:[#allocation10_spill]] %s3289_s26  ;;  %p2562_p4 = por %p139_p3, %p138_p1 }
  0x11   : > { %s1992_s7 = sshll.u32 %s3289_s26, 1  ;;  %s118_s9 = sadd.s32 %s2477_s23, %s117_s30 }
  0x12   : > { %s120_s8 = ssub.s32 1, %s1992_s7  ;;  %s124_s11 = ssub.s32 %s2477_s23, %s3289_s26 }
  0x13   : > { %s121_s10 = smul.u32 %s120_s8, %s3285_s25  ;;  %p249_p7 = pnand %p1995_p5, %p248_p6 }
  0x14   : > { %s128_s15 = sadd.s32 1, %s2461_s19  ;;  %s282_s17 = sand.u32 (!%p249_p7), 1, %s2457_s18  }
  0x15   : > { %s122_s12 = sadd.s32 %s121_s10, %s3289_s26  ;;  %s1997_s27 = sshll.u32 (!%p249_p7), %s2469_s21, 1 }
  0x16   : > { %s123_s13 = ssub.s32 %s118_s9, %s122_s12  ;;  %s1996_s28 = sshll.u32 (!%p249_p7), %s282_s17, 6 }
  0x17   : > { %s125_s14 = sor.u32 %s124_s11, %s123_s13  ;;  %s2580_s29 = ssub.s32 (!%p249_p7), 1, %s1997_s27 }
  0x18   : > { %p126_p8 = scmp.eq.s32.totalorder %s125_s14, 0  ;;  %252 = sbr.rel (%p249_p7) target bundleno = 1482 (0x5ca), region = 32 }
  0x19   : > { %s299_s30 = smul.u32 (!%p249_p7), %s2465_s20, %s2580_s29  ;;  %p302_p9 = scmp.lt.s32.totalorder (!%p249_p7), %s2469_s21, 1 }
  0x1a   : > { %s2576_s16 = scalar_select %p126_p8, %s2461_s19, %s128_s15  }
  0x1b   : > { %s2586_s7 = sadd.s32 (!%p249_p7), %s2469_s21, %s299_s30  ;;  %p2006_p11 = scmp.ne.s32.totalorder (!%p249_p7), %s2465_s20, 0 }
  0x1c   : > { %3275 = sst [smem:[#allocation11_spill]] %s2576_s16  ;;  %s2589_s8 = sshll.u32 (!%p249_p7), %s2586_s7, 3 }
  0x1d   : > { %s303_s9 = scalar_select %p302_p9, %s2469_s21, 1 }
  0x1e   : > { %p304_p10 = scmp.lt.s32.totalorder %s2589_s8, 15 }
  0x1f   : > { %s2000_s10 = sshll.u32 %s303_s9, 6  ;;  %s2195_s11 = sshll.u32 %s303_s9, 8 }
  0x20   : > { %s305_s12 = scalar_select %p304_p10, %s2589_s8, 15 }
  0x21   : > { %s2597_s14 = scalar_lea.vmem %s3257_s2, %s2195_s11  ;;  %s2004_s15 = sshll.u32 %s303_s9, 3 }
  0x22   : > { %s1999_s17 = sshll.u32 %s305_s12, 2  ;;  %s2602_s26 = scalar_lea.vmem %s3259_s4, %s2004_s15 }
  0x23   : > { %s308_s25 = sadd.s32 %s2000_s10, %s1999_s17  ;;  %s2607_s16 = scalar_lea.vmem %s3260_s5, %s2004_s15 }
  0x24   : > { %s2001_s19 = sshll.u32 %s308_s25, 3  ;;  %s2614_s11 = scalar_lea.vmem [#allocation4], %s1996_s28 }
  0x25   : > { %s2612_s18 = scalar_lea.vmem %s3256_s1, %s2001_s19  ;;  %337 = sbr.rel (%p2006_p11) target bundleno = 45 (0x2d), region = 36 }
  0x2a   : > { %v2483_v0 = vmov 0.0  }
  0x2b   : > { %338 = vst [vmem:[#allocation2] sm:$0xff] %v2483_v0 }
  0x2c   : > { %339 = vst [vmem:[#allocation3] sm:$0xff] %v2483_v0 }
  0x2d PF: > { %v2125_v1 = vld [vmem:[%s2597_s14 + $0xe0] sm:$0xf]  ;;  %v2226_v2 = vld [vmem:[%s2597_s14 + $0xec] sm:$0xf0]  ;;  %v2224_v3 = vld [vmem:[%s2597_s14 + $0xe4] sm:$0xf] }
  0x2e   : > { %v2620_v4 = vor.u32 %v2226_v2, %v2125_v1  ;;  %v2127_v5 = vld [vmem:[%s2597_s14 + $0xf0] sm:$0xf0]  ;;  %v2225_v6 = vld [vmem:[%s2597_s14 + $0xec] sm:$0xf]  ;;  %v2135_v7 = vld [vmem:[%s2597_s14 + $0xf8] sm:$0xf0] }
  0x2f   : > { %v2625_v8 = vor.u32 %v2224_v3, %v2127_v5  ;;  %v2627_v9 = vor.u32 %v2225_v6, %v2135_v7  ;;  %v2109_v10 = vld [vmem:[%s2597_s14 + $0xc0] sm:$0xf]  ;;  %v2222_v11 = vld [vmem:[%s2597_s14 + $0xcc] sm:$0xf0]  ;;  %v2220_v12 = vld [vmem:[%s2597_s14 + $0xc4] sm:$0xf] }
  0x30   : > { %549 = vmatpush.bf16.msra.mxu0 %v2620_v4  ;;  %v2633_v13 = vor.u32 %v2222_v11, %v2109_v10  ;;  %v2111_v14 = vld [vmem:[%s2597_s14 + $0xd0] sm:$0xf0]  ;;  %v2221_v15 = vld [vmem:[%s2597_s14 + $0xcc] sm:$0xf]  ;;  %v2119_v16 = vld [vmem:[%s2597_s14 + $0xd8] sm:$0xf0] }
  0x31   : > { %562 = vmatpush.bf16.msra.mxu1 %v2625_v8  ;;  %588 = vmatpush.bf16.msra.mxu3 %v2627_v9  ;;  %v2640_v17 = vor.u32 %v2220_v12, %v2111_v14  ;;  %v2642_v18 = vor.u32 %v2221_v15, %v2119_v16  ;;  %v2133_v19 = vld [vmem:[%s2597_s14 + $0xe8] sm:$0xf]  ;;  %v2227_v20 = vld [vmem:[%s2597_s14 + $0xf4] sm:$0xf0]  ;;  %v2093_v21 = vld [vmem:[%s2597_s14 + $0xa0] sm:$0xf] }
  0x32   : > { %v2647_v22 = vor.u32 %v2227_v20, %v2133_v19  ;;  %v2218_v23 = vld [vmem:[%s2597_s14 + $0xac] sm:$0xf0]  ;;  %v2216_v24 = vld [vmem:[%s2597_s14 + $0xa4] sm:$0xf]  ;;  %v2095_v25 = vld [vmem:[%s2597_s14 + $0xb0] sm:$0xf0] }
  0x33   : > { %v2217_v26 = vld [vmem:[%s2597_s14 + $0xac] sm:$0xf]  ;;  %v2103_v27 = vld [vmem:[%s2597_s14 + $0xb8] sm:$0xf0]  ;;  %v2117_v28 = vld [vmem:[%s2597_s14 + $0xc8] sm:$0xf]  ;;  %v2657_v29 = vor.u32 %v2218_v23, %v2093_v21  ;;  %v2664_v33 = vor.u32 %v2216_v24, %v2095_v25 }
  0x34   : > { %550 = vmatpush.bf16.msra.mxu0 %v2633_v13  ;;  %575 = vmatpush.bf16.msra.mxu2 %v2647_v22  ;;  %v2223_v30 = vld [vmem:[%s2597_s14 + $0xd4] sm:$0xf0]  ;;  %v2077_v31 = vld [vmem:[%s2597_s14 + $0x80] sm:$0xf]  ;;  %v2214_v32 = vld [vmem:[%s2597_s14 + $0x8c] sm:$0xf0]  ;;  %v2666_v34 = vor.u32 %v2217_v26, %v2103_v27 }
  0x35   : > { %563 = vmatpush.bf16.msra.mxu1 %v2640_v17  ;;  %589 = vmatpush.bf16.msra.mxu3 %v2642_v18  ;;  %v2668_v35 = vor.u32 %v2223_v30, %v2117_v28  ;;  %v2212_v36 = vld [vmem:[%s2597_s14 + $0x84] sm:$0xf]  ;;  %v2079_v37 = vld [vmem:[%s2597_s14 + $0x90] sm:$0xf0]  ;;  %v2213_v38 = vld [vmem:[%s2597_s14 + $0x8c] sm:$0xf]  ;;  %v2678_v42 = vor.u32 %v2214_v32, %v2077_v31 }
  0x36   : > { %v2087_v39 = vld [vmem:[%s2597_s14 + $0x98] sm:$0xf0]  ;;  %v2101_v40 = vld [vmem:[%s2597_s14 + $0xa8] sm:$0xf]  ;;  %v2219_v41 = vld [vmem:[%s2597_s14 + $0xb4] sm:$0xf0]  ;;  %v2686_v46 = vor.u32 %v2212_v36, %v2079_v37 }
  0x37   : > { %v2680_v43 = vor.u32 %v2219_v41, %v2101_v40  ;;  %v2061_v44 = vld [vmem:[%s2597_s14 + $0x60] sm:$0xf]  ;;  %v2210_v45 = vld [vmem:[%s2597_s14 + $0x6c] sm:$0xf0]  ;;  %v2688_v47 = vor.u32 %v2213_v38, %v2087_v39  ;;  %v2208_v48 = vld [vmem:[%s2597_s14 + $0x64] sm:$0xf] }
  0x38   : > { %551 = vmatpush.bf16.msra.mxu0 %v2657_v29  ;;  %576 = vmatpush.bf16.msra.mxu2 %v2668_v35  ;;  %v2085_v49 = vld [vmem:[%s2597_s14 + $0x88] sm:$0xf]  ;;  %v2215_v50 = vld [vmem:[%s2597_s14 + $0x94] sm:$0xf0]  ;;  %v2063_v51 = vld [vmem:[%s2597_s14 + $0x70] sm:$0xf0]  ;;  %v2698_v54 = vor.u32 %v2210_v45, %v2061_v44 }
  0x39   : > { %564 = vmatpush.bf16.msra.mxu1 %v2664_v33  ;;  %590 = vmatpush.bf16.msra.mxu3 %v2666_v34  ;;  %v2209_v52 = vld [vmem:[%s2597_s14 + $0x6c] sm:$0xf]  ;;  %v2071_v53 = vld [vmem:[%s2597_s14 + $0x78] sm:$0xf0]  ;;  %v2700_v55 = vor.u32 %v2215_v50, %v2085_v49  ;;  %v2045_v56 = vld [vmem:[%s2597_s14 + $0x40] sm:$0xf]  ;;  %v2706_v58 = vor.u32 %v2208_v48, %v2063_v51 }
  0x3a   : > { %v2206_v57 = vld [vmem:[%s2597_s14 + $0x4c] sm:$0xf0]  ;;  %v2708_v59 = vor.u32 %v2209_v52, %v2071_v53  ;;  %v2204_v60 = vld [vmem:[%s2597_s14 + $0x44] sm:$0xf]  ;;  %v2069_v61 = vld [vmem:[%s2597_s14 + $0x68] sm:$0xf] }
  0x3b   : > { %v2211_v62 = vld [vmem:[%s2597_s14 + $0x74] sm:$0xf0]  ;;  %v2047_v63 = vld [vmem:[%s2597_s14 + $0x50] sm:$0xf0]  ;;  %v2205_v0 = vld [vmem:[%s2597_s14 + $0x4c] sm:$0xf]  ;;  %v2719_v3 = vor.u32 %v2206_v57, %v2045_v56 }
  0x3c   : > { %552 = vmatpush.bf16.msra.mxu0 %v2678_v42  ;;  %577 = vmatpush.bf16.msra.mxu2 %v2680_v43  ;;  %v2055_v1 = vld [vmem:[%s2597_s14 + $0x58] sm:$0xf0]  ;;  %v2029_v2 = vld [vmem:[%s2597_s14 + $0x20] sm:$0xf]  ;;  %v2721_v5 = vor.u32 %v2211_v62, %v2069_v61  ;;  %v2202_v6 = vld [vmem:[%s2597_s14 + $0x2c] sm:$0xf0]  ;;  %v2728_v11 = vor.u32 %v2204_v60, %v2047_v63 }
  0x3d   : > { %565 = vmatpush.bf16.msra.mxu1 %v2686_v46  ;;  %591 = vmatpush.bf16.msra.mxu3 %v2688_v47  ;;  %v2200_v7 = vld [vmem:[%s2597_s14 + $0x24] sm:$0xf]  ;;  %v2031_v10 = vld [vmem:[%s2597_s14 + $0x30] sm:$0xf0]  ;;  %v2730_v12 = vor.u32 %v2205_v0, %v2055_v1  ;;  %v2053_v14 = vld [vmem:[%s2597_s14 + $0x48] sm:$0xf]  ;;  %v2749_v23 = vor.u32 %v2202_v6, %v2029_v2 }
  0x3e   : > { %v2207_v15 = vld [vmem:[%s2597_s14 + $0x54] sm:$0xf0]  ;;  %v2201_v16 = vld [vmem:[%s2597_s14 + $0x2c] sm:$0xf]  ;;  %v2039_v19 = vld [vmem:[%s2597_s14 + $0x38] sm:$0xf0]  ;;  %v2763_v27 = vor.u32 %v2200_v7, %v2031_v10 }
  0x3f   : > { %v2484_v20 = vmov 0   ;;  %s2738_s3 = smul.u32 7, %s2469_s21  ;;  %v2744_v21 = vld [vmem:[%s3255_s0] sm:$0xff]  ;;  %v2751_v24 = vor.u32 %v2207_v15, %v2053_v14  ;;  %v2198_v26 = vld [vmem:[%s2597_s14 + $0xc] sm:$0xf0]  ;;  %v2765_v28 = vor.u32 %v2201_v16, %v2039_v19  ;;  %s2149_s30 = sshll.u32 %s2580_s29, 1 }
  0x40   : > { %553 = vmatpush.bf16.msra.mxu0 %v2698_v54  ;;  %578 = vmatpush.bf16.msra.mxu2 %v2700_v55  ;;  %v2013_v25 = vld [vmem:[%s2597_s14] sm:$0xf]  ;;  %v2196_v30 = vld [vmem:[%s2597_s14 + $0x4] sm:$0xf]  ;;  %v2037_v31 = vld [vmem:[%s2597_s14 + $0x28] sm:$0xf] }
  0x41   : > { %566 = vmatpush.bf16.msra.mxu1 %v2706_v58  ;;  %592 = vmatpush.bf16.msra.mxu3 %v2708_v59  ;;  %s668_s23 = sadd.s32 %s2589_s8, %s2738_s3  ;;  %s2759_s24 = sadd.s32 %s2738_s3, %s2580_s29  ;;  %v2203_v32 = vld [vmem:[%s2597_s14 + $0x34] sm:$0xf0]  ;;  %v2015_v37 = vld [vmem:[%s2597_s14 + $0x10] sm:$0xf0]  ;;  %v2197_v38 = vld [vmem:[%s2597_s14 + $0xc] sm:$0xf]  ;;  %v2780_v41 = vor.u32 %v2198_v26, %v2013_v25 }
  0x42   : > { %2295 = vset.pattern.permute.xlu0 %v2484_v20  ;;  %2296 = vset.pattern.permute.xlu1 %v2484_v20  ;;  %v669_v36 = vstv %s668_s23  ;;  %v2023_v39 = vld [vmem:[%s2597_s14 + $0x18] sm:$0xf0]  ;;  %s810_s25 = sadd.s32 %s2589_s8, %s2759_s24  ;;  %s1396_s28 = smul.u32 6, %s2580_s29  ;;  %v2782_v44 = vld [vmem:[#allocation2] sm:$0xff]  ;;  %v2784_v45 = vor.u32 %v2203_v32, %v2037_v31  ;;  %v2788_v48 = vor.u32 %v2196_v30, %v2015_v37  ;;  %v2021_v51 = vld [vmem:[%s2597_s14 + $0x8] sm:$0xf] }
  0x43   : > { %2297 = vset.pattern.permute.xlu2 %v2484_v20  ;;  %vm670_vm0 = vcmp.lt.s32.totalorder %v669_v36, %v2744_v21  ;;  %v2790_v49 = vor.u32 %v2197_v38, %v2023_v39  ;;  %v811_v50 = vstv %s810_s25  ;;  %v2199_v52 = vld [vmem:[%s2597_s14 + $0x14] sm:$0xf0]  ;;  %v388_v53 = vpack.c.bf16 %v2782_v44, %v2782_v44  ;;  %s2228_s12 = smul.u32 224, %s2469_s21  ;;  %s2229_s17 = sshll.u32 %s2759_s24, 5 }
  0x44   : > { %554 = vmatpush.bf16.msra.mxu0 %v2719_v3  ;;  %579 = vmatpush.bf16.msra.mxu2 %v2721_v5  ;;  %v671_v40 = vsel %vm670_vm0, 1, %v2484_v20  ;;  %s2797_s9 = sadd.s32 %s1396_s28, %s2738_s3  ;;  %vm812_vm1 = vcmp.lt.s32.totalorder %v811_v50, %v2744_v21  ;;  %v2804_v56 = vor.u32 %v2199_v52, %v2021_v51  ;;  %s2142_s14 = smul.u32 56, %s2469_s21 }
  0x45   : > { %567 = vmatpush.bf16.msra.mxu1 %v2728_v11  ;;  %593 = vmatpush.bf16.msra.mxu3 %v2730_v12  ;;  %s1525_s10 = sadd.s32 %s2589_s8, %s2797_s9  ;;  %v813_v57 = vsel %vm812_vm1, 1, %v2484_v20  ;;  %s383_s13 = scalar_lea.vmem %s2612_s18, %s2228_s12 }
  0x46   : > { %673 = vperm.xlu0 %2295, %v671_v40   ;;  %v1526_v60 = vstv %s1525_s10  ;;  %v384_v62 = vld [vmem:[%s383_s13] sm:$0xff]  ;;  %v385_v63 = vld [vmem:[%s383_s13 + $0x8] sm:$0xff]  ;;  %v387_v14 = vld [vmem:[%s383_s13 + $0x18] sm:$0xff]  ;;  %s678_s15 = scalar_lea.vmem %s2614_s11, %s2142_s14 [#allocation4]  ;;  %s2924_s27 = scalar_lea.vmem %s2612_s18, %s2229_s17 }
  0x47   : > { %vm1527_vm2 = vcmp.lt.s32.totalorder %v1526_v60, %v2744_v21  ;;  %v386_v38 = vld [vmem:[%s383_s13 + $0x10] sm:$0xff]  ;;  %s967_s19 = smul.u32 3, %s2580_s29  ;;  %s2932_s22 = sadd.s32 %s2149_s30, %s2738_s3 }
  0x48   : > { %555 = vmatpush.bf16.msra.mxu0 %v2749_v23  ;;  %580 = vmatpush.bf16.msra.mxu2 %v2751_v24  ;;  %v1528_v61 = vsel %vm1527_vm2, 1, %v2484_v20  ;;  %s953_s25 = sadd.s32 %s2589_s8, %s2932_s22  ;;  %s1539_s10 = smul.u32 7, %s2580_s29 }
  0x49   : > { %568 = vmatpush.bf16.msra.mxu1 %v2763_v27  ;;  %594 = vmatpush.bf16.msra.mxu3 %v2765_v28  ;;  %s2935_s23 = sadd.s32 %s967_s19, %s2738_s3  ;;  %s2148_s14 = sshll.u32 %s2759_s24, 3 }
  0x4a   : > { %s1096_s28 = sadd.s32 %s2589_s8, %s2935_s23  ;;  %s2949_s12 = sadd.s32 %s1539_s10, %s2738_s3 }
  0x4b   : > { %s1668_s13 = sadd.s32 %s2589_s8, %s2949_s12  ;;  %s2230_s24 = sshll.u32 %s2932_s22, 5 }
  0x4c   : > { %556 = vmatpush.bf16.msra.mxu0 %v2780_v41  ;;  %581 = vmatpush.bf16.msra.mxu2 %v2784_v45  ;;  %s828_s17 = scalar_lea.vmem %s2612_s18, %s2230_s24  ;;  %s2231_s19 = sshll.u32 %s2935_s23, 5 }
  0x4d   : > { %569 = vmatpush.bf16.msra.mxu1 %v2788_v48  ;;  %595 = vmatpush.bf16.msra.mxu3 %v2790_v49  ;;  %p2187_p12 = scmp.ne.s32.totalorder %s2465_s20, 1 }
  0x4e   : > { %815 = vperm.xlu0 %2295, %v813_v57  }
  0x4f   : > { %557 = vmatmul.bf16.vlgmr.msra.gmra.mxu0 %v388_v53 }
  0x50   : > { %691 = vmatpush.bf16.msrb.mxu0 %v2620_v4  ;;  %570 = vmatmul.bf16.vlgmr.msra.gmra.mxu1 %v388_v53 }
  0x51   : > { %704 = vmatpush.bf16.msrb.mxu1 %v2625_v8  ;;  %730 = vmatpush.bf16.msrb.mxu3 %v2627_v9 }
  0x52   : > { %596 = vmatmul.bf16.vlgmr.msra.gmra.mxu3 %v388_v53  ;;  %582 = vmatpush.bf16.msra.mxu2 %v2804_v56 }
  0x54   : > { %692 = vmatpush.bf16.msrb.mxu0 %v2633_v13 }
  0x55   : > { %705 = vmatpush.bf16.msrb.mxu1 %v2640_v17  ;;  %583 = vmatmul.bf16.vlgmr.msra.gmra.mxu2 %v388_v53 }
  0x56   : > { %717 = vmatpush.bf16.msrb.mxu2 %v2647_v22  ;;  %731 = vmatpush.bf16.msrb.mxu3 %v2642_v18 }
  0x57   : > { %1530 = vperm.xlu0 %2295, %v1528_v61  }
  0x58   : > { %693 = vmatpush.bf16.msrb.mxu0 %v2657_v29 }
  0x59   : > { %706 = vmatpush.bf16.msrb.mxu1 %v2664_v33 }
  0x5a   : > { %718 = vmatpush.bf16.msrb.mxu2 %v2668_v35  ;;  %732 = vmatpush.bf16.msrb.mxu3 %v2666_v34 }
  0x5c   : > { %694 = vmatpush.bf16.msrb.mxu0 %v2678_v42 }
  0x5d   : > { %707 = vmatpush.bf16.msrb.mxu1 %v2686_v46 }
  0x5e   : > { %719 = vmatpush.bf16.msrb.mxu2 %v2680_v43  ;;  %733 = vmatpush.bf16.msrb.mxu3 %v2688_v47 }
  0x60   : > { %695 = vmatpush.bf16.msrb.mxu0 %v2698_v54 }
  0x61   : > { %708 = vmatpush.bf16.msrb.mxu1 %v2706_v58 }
  0x62   : > { %720 = vmatpush.bf16.msrb.mxu2 %v2700_v55  ;;  %734 = vmatpush.bf16.msrb.mxu3 %v2708_v59 }
  0x64   : > { %696 = vmatpush.bf16.msrb.mxu0 %v2719_v3 }
  0x65   : > { %709 = vmatpush.bf16.msrb.mxu1 %v2728_v11 }
  0x66   : > { %721 = vmatpush.bf16.msrb.mxu2 %v2721_v5  ;;  %735 = vmatpush.bf16.msrb.mxu3 %v2730_v12 }
  0x68   : > { %697 = vmatpush.bf16.msrb.mxu0 %v2749_v23 }
  0x69   : > { %710 = vmatpush.bf16.msrb.mxu1 %v2763_v27 }
  0x6a   : > { %722 = vmatpush.bf16.msrb.mxu2 %v2751_v24  ;;  %736 = vmatpush.bf16.msrb.mxu3 %v2765_v28 }
  0x6c   : > { %698 = vmatpush.bf16.msrb.mxu0 %v2780_v41 }
  0x6d   : > { %711 = vmatpush.bf16.msrb.mxu1 %v2788_v48 }
  0x6e   : > { %723 = vmatpush.bf16.msrb.mxu2 %v2784_v45  ;;  %737 = vmatpush.bf16.msrb.mxu3 %v2790_v49 }
  0x70   : > { %834 = vmatpush.bf16.msra.mxu0 %v2620_v4 }
  0x71   : > { %847 = vmatpush.bf16.msra.mxu1 %v2625_v8 }
  0x72   : > { %873 = vmatpush.bf16.msra.mxu3 %v2627_v9  ;;  %724 = vmatpush.bf16.msrb.mxu2 %v2804_v56 }
  0x74   : > { %835 = vmatpush.bf16.msra.mxu0 %v2633_v13 }
  0x75   : > { %848 = vmatpush.bf16.msra.mxu1 %v2640_v17 }
  0x76   : > { %860 = vmatpush.bf16.msra.mxu2 %v2647_v22  ;;  %874 = vmatpush.bf16.msra.mxu3 %v2642_v18 }
  0x78   : > { %836 = vmatpush.bf16.msra.mxu0 %v2657_v29 }
  0x79   : > { %849 = vmatpush.bf16.msra.mxu1 %v2664_v33 }
  0x7a   : > { %861 = vmatpush.bf16.msra.mxu2 %v2668_v35  ;;  %875 = vmatpush.bf16.msra.mxu3 %v2666_v34 }
  0x7c   : > { %837 = vmatpush.bf16.msra.mxu0 %v2678_v42 }
  0x7d   : > { %850 = vmatpush.bf16.msra.mxu1 %v2686_v46 }
  0x7e   : > { %862 = vmatpush.bf16.msra.mxu2 %v2680_v43  ;;  %876 = vmatpush.bf16.msra.mxu3 %v2688_v47 }
  0x80   : > { %838 = vmatpush.bf16.msra.mxu0 %v2698_v54 }
  0x81   : > { %851 = vmatpush.bf16.msra.mxu1 %v2706_v58 }
  0x82   : > { %863 = vmatpush.bf16.msra.mxu2 %v2700_v55  ;;  %877 = vmatpush.bf16.msra.mxu3 %v2708_v59 }
  0x84   : > { %839 = vmatpush.bf16.msra.mxu0 %v2719_v3 }
  0x85   : > { %852 = vmatpush.bf16.msra.mxu1 %v2728_v11 }
  0x86   : > { %864 = vmatpush.bf16.msra.mxu2 %v2721_v5  ;;  %878 = vmatpush.bf16.msra.mxu3 %v2730_v12 }
  0x88   : > { %840 = vmatpush.bf16.msra.mxu0 %v2749_v23 }
  0x89   : > { %853 = vmatpush.bf16.msra.mxu1 %v2763_v27 }
  0x8a   : > { %865 = vmatpush.bf16.msra.mxu2 %v2751_v24  ;;  %879 = vmatpush.bf16.msra.mxu3 %v2765_v28 }
  0x8c   : > { %841 = vmatpush.bf16.msra.mxu0 %v2780_v41 }
  0x8d   : > { %854 = vmatpush.bf16.msra.mxu1 %v2788_v48 }
  0x8e   : > { %866 = vmatpush.bf16.msra.mxu2 %v2784_v45  ;;  %880 = vmatpush.bf16.msra.mxu3 %v2790_v49 }
  0x92   : > { %867 = vmatpush.bf16.msra.mxu2 %v2804_v56 }
  0xcc   : > { %v558_v0 = vpop.f32.mrf.mxu0 }
  0xcd   : > { %v601_v1 = vadd.f32 %v558_v0, %v384_v62  ;;  %v571_v2 = vpop.f32.mrf.mxu1 }
  0xce   : > { %v602_v6 = vadd.f32 %v571_v2, %v385_v63 }
  0xcf   : > { %v2139_v7 = vmul.f32 -1.442695, %v601_v1 }
  0xd0   : > { %v2140_v10 = vmul.f32 -1.442695, %v602_v6 }
  0xd1   : > { %2298 = vpow2.f32 %v2139_v7 }
  0xd2   : > { %2300 = vpow2.f32 %v2140_v10 }
  0xd4   : > { %v560_v19 = vpop.f32.mrf.mxu0 }
  0xd5   : > { %v597_v15 = vpop.f32.mrf.mxu3  ;;  %v573_v25 = vpop.f32.mrf.mxu1 }
  0xd6   : > { %v604_v16 = vadd.f32 %v597_v15, %v387_v14 }
  0xd7   : > { %v2299_v30 = vpop.eup %2298 }
  0xd8   : > { %v2141_v26 = vmul.f32 -1.442695, %v604_v16  ;;  %v584_v31 = vpop.f32.mrf.mxu2  ;;  %v2301_v32 = vpop.eup %2300  ;;  %v608_v36 = vadd.f32 1.0, %v2299_v30 }
  0xd9   : > { %v627_v37 = vadd.f32 1.0, %v2301_v32  ;;  %v603_v50 = vadd.f32 %v584_v31, %v386_v38  ;;  %v379_v31 = vld [vmem:[#allocation3] sm:$0xff] }
  0xda   : > { %2302 = vpow2.f32 %v2141_v26  ;;  %v620_v0 = vand.u32 2147483648, %v608_v36  ;;  %v618_v2 = vand.u32 2147483647, %v608_v36  ;;  %vm614_vm5 = vweird.f32 %v608_v36 }
  0xdb   : > { %2304 = vrcp.f32 %v608_v36  ;;  %v639_v6 = vand.u32 2147483648, %v627_v37  ;;  %v637_v10 = vand.u32 2147483647, %v627_v37  ;;  %vm633_vm7 = vweird.f32 %v627_v37 }
  0xdc   : > { %2306 = vrcp.f32 %v627_v37  ;;  %v621_v25 = vor.u32 1.1754944e-38, %v620_v0  ;;  %vm619_vm8 = vcmp.eq.f32.partialorder %v618_v2, 8.507059e+37 }
  0xdd   : > { %v599_v39 = vpop.f32.mrf.mxu3  ;;  %v640_v32 = vor.u32 1.1754944e-38, %v639_v6  ;;  %vm638_vm10 = vcmp.eq.f32.partialorder %v637_v10, 8.507059e+37 }
  0xe0   : > { %v2303_v40 = vpop.eup %2302  ;;  %v586_v52 = vpop.f32.mrf.mxu2 }
  0xe1   : > { %v647_v51 = vadd.f32 1.0, %v2303_v40  ;;  %v2305_v53 = vpop.eup %2304 }
  0xe2   : > { %v2307_v57 = vpop.eup %2306  ;;  %v610_v60 = vmul.f32 %v2305_v53, %v608_v36  ;;  %vm615_vm3 = vweird.f32 %v2305_v53 }
  0xe3   : > { %2308 = vrcp.f32 %v647_v51  ;;  %v629_v61 = vmul.f32 %v2307_v57, %v627_v37  ;;  %vm634_vm4 = vweird.f32 %v2307_v57  ;;  %vm616_vm6 = vmor %vm614_vm5, %vm615_vm3  ;;  %v659_v37 = vand.u32 2147483648, %v647_v51 }
  0xe4   : > { %2310 = vtanh.f32 %v603_v50  ;;  %v611_v62 = vsub.f32 1.0, %v610_v60  ;;  %vm635_vm9 = vmor %vm633_vm7, %vm634_vm4  ;;  %v674_v60 = vpop.permute.xlu0 %673  ;;  %vm653_vm13 = vweird.f32 %v647_v51  ;;  %v657_v0 = vand.u32 2147483647, %v647_v51 }
  0xe5   : > { %v630_v63 = vsub.f32 1.0, %v629_v61  ;;  %vm675_vm11 = vcmp.eq.s32.totalorder %v674_v60, 1 }
  0xe6   : > { %v612_v1 = vmul.f32 %v2305_v53, %v611_v62  ;;  %vm658_vm15 = vcmp.eq.f32.partialorder %v657_v0, 8.507059e+37 }
  0xe7   : > { %v631_v7 = vmul.f32 %v2307_v57, %v630_v63 }
  0xe8   : > { %v613_v15 = vadd.f32 %v2305_v53, %v612_v1  ;;  %v660_v1 = vor.u32 1.1754944e-38, %v659_v37 }
  0xe9   : > { %v2309_v14 = vpop.eup %2308  ;;  %v632_v26 = vadd.f32 %v2307_v57, %v631_v7 }
  0xea   : > { %v2311_v16 = vpop.eup %2310  ;;  %v649_v19 = vmul.f32 %v2309_v14, %v647_v51  ;;  %v617_v30 = vsel %vm616_vm6, %v2305_v53, %v613_v15  ;;  %vm654_vm12 = vweird.f32 %v2309_v14  ;;  %v687_v51 = vld [vmem:[%s2924_s27 + $0x8] sm:$0xff] }
  0xeb   : > { %v622_v39 = vsel %vm619_vm8, %v621_v25, %v617_v30  ;;  %v636_v40 = vsel %vm635_vm9, %v2307_v57, %v632_v26  ;;  %vm655_vm14 = vmor %vm653_vm13, %vm654_vm12 }
  0xec   : > { %v650_v38 = vsub.f32 1.0, %v649_v19  ;;  %v664_v50 = vmul.f32 %v2311_v16, %v622_v39  ;;  %v641_v52 = vsel %vm638_vm10, %v640_v32, %v636_v40  ;;  %v689_v32 = vld [vmem:[%s2924_s27 + $0x18] sm:$0xff] }
  0xed   : > { %v663_v61 = vmul.f32 %v641_v52, %v379_v31 }
  0xee   : > { %v651_v36 = vmul.f32 %v2309_v14, %v650_v38 }
  0xef   : > { %v665_v62 = vadd.f32 %v664_v50, %v663_v61 }
  0xf0   : > { %v652_v63 = vadd.f32 %v2309_v14, %v651_v36 }
  0xf1   : > { %2312 = vtanh.f32 %v665_v62  ;;  %v2879_v53 = vsel %vm675_vm11, %v665_v62, %v379_v31 }
  0xf2   : > { %v656_v57 = vsel %vm655_vm14, %v2309_v14, %v652_v63 }
  0xf3   : > { %v661_v6 = vsel %vm658_vm15, %v660_v1, %v656_v57  ;;  %v688_v57 = vld [vmem:[%s2924_s27 + $0x10] sm:$0xff]  ;;  %v954_v1 = vstv %s953_s25  ;;  %s2162_s25 = sshll.u32 %s2580_s29, 2 }
  0xf4   : > { %vm955_vm0 = vcmp.lt.s32.totalorder %v954_v1, %v2744_v21  ;;  %s3065_s10 = sadd.s32 %s2162_s25, %s2738_s3 }
  0xf7   : > { %v2313_v2 = vpop.eup %2312 }
  0xf8   : > { %v667_v7 = vmul.f32 %v2313_v2, %v661_v6 }
  0xfa   : > { %v676_v10 = vsel %vm675_vm11, %v667_v7, 0.0  ;;  %v2886_v15 = vsel %vm675_vm11, %v667_v7, %v2782_v44  ;;  %v686_v44 = vld [vmem:[%s2924_s27] sm:$0xff]  ;;  %s2155_s27 = sshll.u32 %s2932_s22, 3  ;;  %s3057_s22 = scalar_lea.vmem %s2612_s18, %s2231_s19 }
  0xfb   : > { %679 = vst [vmem:[%s678_s15] sm:$0xff] %v676_v10  ;;  %v690_v16 = vpack.c.bf16 %v2886_v15, %v2886_v15  ;;  %v956_v10 = vsel %vm955_vm0, 1, %v2484_v20  ;;  %s820_s15 = scalar_lea.vmem %s2614_s11, %s2148_s14 [#allocation4]  ;;  %s963_s30 = scalar_lea.vmem %s2614_s11, %s2155_s27 [#allocation4] }
  0xfc   : > { %958 = vperm.xlu1 %2296, %v956_v10   ;;  %s1239_s14 = sadd.s32 %s2589_s8, %s3065_s10  ;;  %s2168_s27 = sshll.u32 %s3065_s10, 3 }
  0xfd   : > { %699 = vmatmul.bf16.vlgmr.msrb.gmra.mxu0 %v690_v16  ;;  %712 = vmatmul.bf16.vlgmr.msrb.gmra.mxu1 %v690_v16 }
  0xfe   : > { %725 = vmatmul.bf16.vlgmr.msrb.gmra.mxu2 %v690_v16  ;;  %738 = vmatmul.bf16.vlgmr.msrb.gmra.mxu3 %v690_v16  ;;  %v1097_v16 = vstv %s1096_s28  ;;  %s1253_s28 = smul.u32 5, %s2580_s29 }
  0xff   : > { %977 = vmatpush.bf16.msrb.mxu0 %v2620_v4  ;;  %990 = vmatpush.bf16.msrb.mxu1 %v2625_v8  ;;  %vm1098_vm1 = vcmp.lt.s32.totalorder %v1097_v16, %v2744_v21 }
 0x100   : > { %1003 = vmatpush.bf16.msrb.mxu2 %v2647_v22  ;;  %1016 = vmatpush.bf16.msrb.mxu3 %v2627_v9 }
 0x103   : > { %978 = vmatpush.bf16.msrb.mxu0 %v2633_v13  ;;  %991 = vmatpush.bf16.msrb.mxu1 %v2640_v17 }
 0x104   : > { %1004 = vmatpush.bf16.msrb.mxu2 %v2668_v35  ;;  %1017 = vmatpush.bf16.msrb.mxu3 %v2642_v18 }
 0x107   : > { %979 = vmatpush.bf16.msrb.mxu0 %v2657_v29  ;;  %992 = vmatpush.bf16.msrb.mxu1 %v2664_v33 }
 0x108   : > { %1005 = vmatpush.bf16.msrb.mxu2 %v2680_v43  ;;  %1018 = vmatpush.bf16.msrb.mxu3 %v2666_v34 }
 0x10b   : > { %980 = vmatpush.bf16.msrb.mxu0 %v2678_v42  ;;  %993 = vmatpush.bf16.msrb.mxu1 %v2686_v46 }
 0x10c   : > { %1006 = vmatpush.bf16.msrb.mxu2 %v2700_v55  ;;  %1019 = vmatpush.bf16.msrb.mxu3 %v2688_v47 }
 0x10f   : > { %981 = vmatpush.bf16.msrb.mxu0 %v2698_v54  ;;  %994 = vmatpush.bf16.msrb.mxu1 %v2706_v58 }
 0x110   : > { %1007 = vmatpush.bf16.msrb.mxu2 %v2721_v5  ;;  %1020 = vmatpush.bf16.msrb.mxu3 %v2708_v59 }
 0x113   : > { %982 = vmatpush.bf16.msrb.mxu0 %v2719_v3  ;;  %995 = vmatpush.bf16.msrb.mxu1 %v2728_v11 }
 0x114   : > { %1008 = vmatpush.bf16.msrb.mxu2 %v2751_v24  ;;  %1021 = vmatpush.bf16.msrb.mxu3 %v2730_v12 }
 0x117   : > { %983 = vmatpush.bf16.msrb.mxu0 %v2749_v23  ;;  %996 = vmatpush.bf16.msrb.mxu1 %v2763_v27 }
 0x118   : > { %1009 = vmatpush.bf16.msrb.mxu2 %v2784_v45  ;;  %1022 = vmatpush.bf16.msrb.mxu3 %v2765_v28 }
 0x11b   : > { %984 = vmatpush.bf16.msrb.mxu0 %v2780_v41  ;;  %997 = vmatpush.bf16.msrb.mxu1 %v2788_v48 }
 0x11c   : > { %1010 = vmatpush.bf16.msrb.mxu2 %v2804_v56  ;;  %1023 = vmatpush.bf16.msrb.mxu3 %v2790_v49 }
 0x17a   : > { %v700_v14 = vpop.f32.mrf.mxu0  ;;  %v713_v19 = vpop.f32.mrf.mxu1 }
 0x17b   : > { %v743_v25 = vadd.f32 %v700_v14, %v686_v44  ;;  %v744_v26 = vadd.f32 %v713_v19, %v687_v51 }
 0x17d   : > { %v2145_v30 = vmul.f32 -1.442695, %v743_v25  ;;  %v2146_v31 = vmul.f32 -1.442695, %v744_v26 }
 0x17f   : > { %2314 = vpow2.f32 %v2145_v30 }
 0x180   : > { %2316 = vpow2.f32 %v2146_v31 }
 0x181   : > { %v726_v38 = vpop.f32.mrf.mxu2  ;;  %v739_v39 = vpop.f32.mrf.mxu3 }
 0x182   : > { %v746_v40 = vadd.f32 %v739_v39, %v689_v32  ;;  %v702_v50 = vpop.f32.mrf.mxu0  ;;  %v715_v52 = vpop.f32.mrf.mxu1  ;;  %v745_v6 = vadd.f32 %v726_v38, %v688_v57 }
 0x184   : > { %v2147_v60 = vmul.f32 -1.442695, %v746_v40  ;;  %v1099_v40 = vsel %vm1098_vm1, 1, %v2484_v20 }
 0x185   : > { %v2315_v36 = vpop.eup %2314  ;;  %1101 = vperm.xlu1 %2296, %v1099_v40  }
 0x186   : > { %v2317_v61 = vpop.eup %2316  ;;  %v750_v62 = vadd.f32 1.0, %v2315_v36  ;;  %2318 = vpow2.f32 %v2147_v60  ;;  %v1669_v36 = vstv %s1668_s13  ;;  %s3068_s13 = sadd.s32 %s1253_s28, %s2738_s3 }
 0x187   : > { %v769_v63 = vadd.f32 1.0, %v2317_v61  ;;  %vm1670_vm10 = vcmp.lt.s32.totalorder %v1669_v36, %v2744_v21  ;;  %s2233_s19 = sshll.u32 %s3068_s13, 5  ;;  %s2174_s25 = sshll.u32 %s3068_s13, 3 }
 0x188   : > { %2320 = vrcp.f32 %v750_v62  ;;  %v760_v31 = vand.u32 2147483647, %v750_v62  ;;  %v762_v32 = vand.u32 2147483648, %v750_v62  ;;  %vm756_vm4 = vweird.f32 %v750_v62  ;;  %s1392_s28 = scalar_lea.vmem %s2614_s11, %s2174_s25 [#allocation4] }
 0x189   : > { %2322 = vrcp.f32 %v769_v63  ;;  %v728_v37 = vpop.f32.mrf.mxu2  ;;  %v741_v0 = vpop.f32.mrf.mxu3  ;;  %v781_v30 = vand.u32 2147483648, %v769_v63  ;;  %v779_v39 = vand.u32 2147483647, %v769_v63  ;;  %vm775_vm5 = vweird.f32 %v769_v63 }
 0x18a   : > { %v763_v61 = vor.u32 1.1754944e-38, %v762_v32  ;;  %vm761_vm8 = vcmp.eq.f32.partialorder %v760_v31, 8.507059e+37 }
 0x18b   : > { %v782_v1 = vor.u32 1.1754944e-38, %v781_v30  ;;  %vm780_vm9 = vcmp.eq.f32.partialorder %v779_v39, 8.507059e+37 }
 0x18c   : > { %v2319_v2 = vpop.eup %2318 }
 0x18d   : > { %v2944_v7 = vadd.f32 1.0, %v2319_v2 }
 0x18e   : > { %v2321_v44 = vpop.eup %2320 }
 0x18f   : > { %v2323_v51 = vpop.eup %2322  ;;  %v752_v14 = vmul.f32 %v2321_v44, %v750_v62  ;;  %2324 = vrcp.f32 %v2944_v7  ;;  %vm757_vm2 = vweird.f32 %v2321_v44  ;;  %vm795_vm13 = vweird.f32 %v2944_v7 }
 0x190   : > { %v771_v19 = vmul.f32 %v2323_v51, %v769_v63  ;;  %2326 = vtanh.f32 %v745_v6  ;;  %vm776_vm3 = vweird.f32 %v2323_v51  ;;  %vm758_vm6 = vmor %vm756_vm4, %vm757_vm2  ;;  %v799_v30 = vand.u32 2147483647, %v2944_v7 }
 0x191   : > { %v753_v25 = vsub.f32 1.0, %v752_v14  ;;  %vm777_vm7 = vmor %vm775_vm5, %vm776_vm3 }
 0x192   : > { %v772_v26 = vsub.f32 1.0, %v771_v19  ;;  %vm800_vm15 = vcmp.eq.f32.partialorder %v799_v30, 8.507059e+37  ;;  %v831_v30 = vld [vmem:[%s828_s17 + $0x10] sm:$0xff] }
 0x193   : > { %v754_v38 = vmul.f32 %v2321_v44, %v753_v25  ;;  %v1671_v25 = vsel %vm1670_vm10, 1, %v2484_v20 }
 0x194   : > { %v773_v50 = vmul.f32 %v2323_v51, %v772_v26  ;;  %v816_v26 = vpop.permute.xlu0 %815  ;;  %1673 = vperm.xlu1 %2296, %v1671_v25  }
 0x195   : > { %v2325_v52 = vpop.eup %2324  ;;  %v755_v60 = vadd.f32 %v2321_v44, %v754_v38  ;;  %vm817_vm11 = vcmp.eq.s32.totalorder %v816_v26, 1 }
 0x196   : > { %v774_v37 = vadd.f32 %v2323_v51, %v773_v50  ;;  %v791_v0 = vmul.f32 %v2325_v52, %v2944_v7  ;;  %v2327_v57 = vpop.eup %2326  ;;  %vm796_vm12 = vweird.f32 %v2325_v52 }
 0x197   : > { %v759_v2 = vsel %vm758_vm6, %v2321_v44, %v755_v60  ;;  %vm797_vm14 = vmor %vm795_vm13, %vm796_vm12 }
 0x198   : > { %v764_v6 = vsel %vm761_vm8, %v763_v61, %v759_v2  ;;  %v778_v10 = vsel %vm777_vm7, %v2323_v51, %v774_v37  ;;  %v792_v16 = vsub.f32 1.0, %v791_v0  ;;  %v801_v51 = vand.u32 2147483648, %v2944_v7  ;;  %v830_v7 = vld [vmem:[%s828_s17 + $0x8] sm:$0xff]  ;;  %v832_v2 = vld [vmem:[%s828_s17 + $0x18] sm:$0xff] }
 0x199   : > { %v783_v62 = vsel %vm780_vm9, %v782_v1, %v778_v10  ;;  %v806_v14 = vmul.f32 %v2327_v57, %v764_v6 }
 0x19a   : > { %v805_v63 = vmul.f32 %v783_v62, %v2879_v53  ;;  %v793_v19 = vmul.f32 %v2325_v52, %v792_v16  ;;  %v802_v38 = vor.u32 1.1754944e-38, %v801_v51 }
 0x19c   : > { %v807_v32 = vadd.f32 %v806_v14, %v805_v63  ;;  %v794_v44 = vadd.f32 %v2325_v52, %v793_v19 }
 0x19e   : > { %2328 = vtanh.f32 %v807_v32  ;;  %v2962_v21 = vsel %vm817_vm11, %v807_v32, %v2879_v53  ;;  %v798_v31 = vsel %vm797_vm14, %v2325_v52, %v794_v44 }
 0x19f   : > { %v803_v40 = vsel %vm800_vm15, %v802_v38, %v798_v31 }
 0x1a4   : > { %v2329_v39 = vpop.eup %2328 }
 0x1a5   : > { %v809_v50 = vmul.f32 %v2329_v39, %v803_v40 }
 0x1a7   : > { %v818_v60 = vsel %vm817_vm11, %v809_v50, 0.0  ;;  %v2971_v36 = vsel %vm817_vm11, %v809_v50, %v2886_v15  ;;  %v829_v15 = vld [vmem:[%s828_s17] sm:$0xff] }
 0x1a8   : > { %v833_v53 = vpack.c.bf16 %v2971_v36, %v2971_v36  ;;  %821 = vst [vmem:[%s820_s15] sm:$0xff] %v818_v60  ;;  %s1382_s15 = sadd.s32 %s2589_s8, %s3068_s13  ;;  %s2161_s8 = sshll.u32 %s2935_s23, 3 }
 0x1a9   : > { %s1106_s3 = scalar_lea.vmem %s2614_s11, %s2161_s8 [#allocation4]  ;;  %s2232_s23 = sshll.u32 %s3065_s10, 5 }
 0x1aa   : > { %842 = vmatmul.bf16.vlgmr.msra.gmra.mxu0 %v833_v53  ;;  %855 = vmatmul.bf16.vlgmr.msra.gmra.mxu1 %v833_v53  ;;  %s1114_s17 = scalar_lea.vmem %s2612_s18, %s2232_s23  ;;  %s2234_s10 = sshll.u32 %s2797_s9, 5 }
 0x1ab   : > { %868 = vmatmul.bf16.vlgmr.msra.gmra.mxu2 %v833_v53  ;;  %881 = vmatmul.bf16.vlgmr.msra.gmra.mxu3 %v833_v53  ;;  %s1400_s13 = scalar_lea.vmem %s2612_s18, %s2234_s10 }
 0x1ac   : > { %1120 = vmatpush.bf16.msra.mxu0 %v2620_v4  ;;  %1133 = vmatpush.bf16.msra.mxu1 %v2625_v8 }
 0x1ad   : > { %1146 = vmatpush.bf16.msra.mxu2 %v2647_v22  ;;  %1159 = vmatpush.bf16.msra.mxu3 %v2627_v9 }
 0x1b0   : > { %1121 = vmatpush.bf16.msra.mxu0 %v2633_v13  ;;  %1134 = vmatpush.bf16.msra.mxu1 %v2640_v17 }
 0x1b1   : > { %1147 = vmatpush.bf16.msra.mxu2 %v2668_v35  ;;  %1160 = vmatpush.bf16.msra.mxu3 %v2642_v18 }
 0x1b4   : > { %1122 = vmatpush.bf16.msra.mxu0 %v2657_v29  ;;  %1135 = vmatpush.bf16.msra.mxu1 %v2664_v33 }
 0x1b5   : > { %1148 = vmatpush.bf16.msra.mxu2 %v2680_v43  ;;  %1161 = vmatpush.bf16.msra.mxu3 %v2666_v34 }
 0x1b8   : > { %1123 = vmatpush.bf16.msra.mxu0 %v2678_v42  ;;  %1136 = vmatpush.bf16.msra.mxu1 %v2686_v46 }
 0x1b9   : > { %1149 = vmatpush.bf16.msra.mxu2 %v2700_v55  ;;  %1162 = vmatpush.bf16.msra.mxu3 %v2688_v47 }
 0x1bc   : > { %1124 = vmatpush.bf16.msra.mxu0 %v2698_v54  ;;  %1137 = vmatpush.bf16.msra.mxu1 %v2706_v58 }
 0x1bd   : > { %1150 = vmatpush.bf16.msra.mxu2 %v2721_v5  ;;  %1163 = vmatpush.bf16.msra.mxu3 %v2708_v59 }
 0x1c0   : > { %1125 = vmatpush.bf16.msra.mxu0 %v2719_v3  ;;  %1138 = vmatpush.bf16.msra.mxu1 %v2728_v11 }
 0x1c1   : > { %1151 = vmatpush.bf16.msra.mxu2 %v2751_v24  ;;  %1164 = vmatpush.bf16.msra.mxu3 %v2730_v12 }
 0x1c4   : > { %1126 = vmatpush.bf16.msra.mxu0 %v2749_v23  ;;  %1139 = vmatpush.bf16.msra.mxu1 %v2763_v27 }
 0x1c5   : > { %1152 = vmatpush.bf16.msra.mxu2 %v2784_v45  ;;  %1165 = vmatpush.bf16.msra.mxu3 %v2765_v28 }
 0x1c8   : > { %1127 = vmatpush.bf16.msra.mxu0 %v2780_v41  ;;  %1140 = vmatpush.bf16.msra.mxu1 %v2788_v48 }
 0x1c9   : > { %1153 = vmatpush.bf16.msra.mxu2 %v2804_v56  ;;  %1166 = vmatpush.bf16.msra.mxu3 %v2790_v49 }
 0x227   : > { %v843_v52 = vpop.f32.mrf.mxu0  ;;  %v856_v61 = vpop.f32.mrf.mxu1 }
 0x228   : > { %v886_v37 = vadd.f32 %v843_v52, %v829_v15  ;;  %v887_v0 = vadd.f32 %v856_v61, %v830_v7 }
 0x22a   : > { %v2152_v57 = vmul.f32 -1.442695, %v886_v37  ;;  %v2153_v1 = vmul.f32 -1.442695, %v887_v0 }
 0x22c   : > { %2330 = vpow2.f32 %v2152_v57 }
 0x22d   : > { %2332 = vpow2.f32 %v2153_v1 }
 0x22e   : > { %v869_v6 = vpop.f32.mrf.mxu2  ;;  %v882_v10 = vpop.f32.mrf.mxu3 }
 0x22f   : > { %v889_v16 = vadd.f32 %v882_v10, %v832_v2  ;;  %v845_v62 = vpop.f32.mrf.mxu0  ;;  %v858_v14 = vpop.f32.mrf.mxu1  ;;  %v888_v40 = vadd.f32 %v869_v6, %v831_v30 }
 0x231   : > { %v2154_v63 = vmul.f32 -1.442695, %v889_v16 }
 0x232   : > { %v2331_v19 = vpop.eup %2330 }
 0x233   : > { %v2333_v25 = vpop.eup %2332  ;;  %v893_v26 = vadd.f32 1.0, %v2331_v19  ;;  %2334 = vpow2.f32 %v2154_v63 }
 0x234   : > { %v912_v32 = vadd.f32 1.0, %v2333_v25 }
 0x235   : > { %2336 = vrcp.f32 %v893_v26  ;;  %v905_v52 = vand.u32 2147483648, %v893_v26  ;;  %v903_v37 = vand.u32 2147483647, %v893_v26  ;;  %vm899_vm2 = vweird.f32 %v893_v26 }
 0x236   : > { %2338 = vrcp.f32 %v912_v32  ;;  %v871_v44 = vpop.f32.mrf.mxu2  ;;  %v884_v51 = vpop.f32.mrf.mxu3  ;;  %v924_v0 = vand.u32 2147483648, %v912_v32  ;;  %v922_v1 = vand.u32 2147483647, %v912_v32  ;;  %vm918_vm4 = vweird.f32 %v912_v32 }
 0x237   : > { %v906_v6 = vor.u32 1.1754944e-38, %v905_v52  ;;  %vm904_vm5 = vcmp.eq.f32.partialorder %v903_v37, 8.507059e+37 }
 0x238   : > { %v925_v63 = vor.u32 1.1754944e-38, %v924_v0  ;;  %vm923_vm7 = vcmp.eq.f32.partialorder %v922_v1, 8.507059e+37 }
 0x239   : > { %v2335_v31 = vpop.eup %2334 }
 0x23a   : > { %v932_v38 = vadd.f32 1.0, %v2335_v31 }
 0x23b   : > { %v2337_v39 = vpop.eup %2336 }
 0x23c   : > { %v2339_v50 = vpop.eup %2338  ;;  %v895_v60 = vmul.f32 %v2337_v39, %v893_v26  ;;  %2340 = vrcp.f32 %v932_v38  ;;  %vm900_vm0 = vweird.f32 %v2337_v39  ;;  %vm938_vm10 = vweird.f32 %v932_v38 }
 0x23d   : > { %v914_v53 = vmul.f32 %v2339_v50, %v912_v32  ;;  %2342 = vtanh.f32 %v888_v40  ;;  %vm919_vm1 = vweird.f32 %v2339_v50  ;;  %vm901_vm3 = vmor %vm899_vm2, %vm900_vm0  ;;  %v959_v40 = vpop.permute.xlu1 %958 }
 0x23e   : > { %v896_v15 = vsub.f32 1.0, %v895_v60  ;;  %vm920_vm6 = vmor %vm918_vm4, %vm919_vm1  ;;  %vm960_vm8 = vcmp.eq.s32.totalorder %v959_v40, 1 }
 0x23f   : > { %v915_v7 = vsub.f32 1.0, %v914_v53 }
 0x240   : > { %v897_v61 = vmul.f32 %v2337_v39, %v896_v15 }
 0x241   : > { %v916_v57 = vmul.f32 %v2339_v50, %v915_v7 }
 0x242   : > { %v2341_v2 = vpop.eup %2340  ;;  %v898_v10 = vadd.f32 %v2337_v39, %v897_v61 }
 0x243   : > { %v934_v16 = vmul.f32 %v2341_v2, %v932_v38  ;;  %v917_v62 = vadd.f32 %v2339_v50, %v916_v57  ;;  %v2343_v19 = vpop.eup %2342  ;;  %vm939_vm9 = vweird.f32 %v2341_v2 }
 0x244   : > { %v902_v14 = vsel %vm901_vm3, %v2337_v39, %v898_v10  ;;  %v944_v39 = vand.u32 2147483648, %v932_v38  ;;  %vm940_vm11 = vmor %vm938_vm10, %vm939_vm9 }
 0x245   : > { %v907_v25 = vsel %vm904_vm5, %v906_v6, %v902_v14  ;;  %v935_v44 = vsub.f32 1.0, %v934_v16  ;;  %v921_v51 = vsel %vm920_vm6, %v2339_v50, %v917_v62  ;;  %v942_v50 = vand.u32 2147483647, %v932_v38  ;;  %v973_v38 = vld [vmem:[%s3057_s22 + $0x8] sm:$0xff] }
 0x246   : > { %v949_v30 = vmul.f32 %v2343_v19, %v907_v25  ;;  %v926_v31 = vsel %vm923_vm7, %v925_v63, %v921_v51  ;;  %v945_v52 = vor.u32 1.1754944e-38, %v944_v39  ;;  %v975_v63 = vld [vmem:[%s3057_s22 + $0x18] sm:$0xff] }
 0x247   : > { %v936_v60 = vmul.f32 %v2341_v2, %v935_v44  ;;  %v948_v26 = vmul.f32 %v926_v31, %v2962_v21  ;;  %vm943_vm12 = vcmp.eq.f32.partialorder %v942_v50, 8.507059e+37  ;;  %v974_v50 = vld [vmem:[%s3057_s22 + $0x10] sm:$0xff] }
 0x249   : > { %v950_v53 = vadd.f32 %v949_v30, %v948_v26  ;;  %v937_v32 = vadd.f32 %v2341_v2, %v936_v60 }
 0x24b   : > { %2344 = vtanh.f32 %v950_v53  ;;  %v3012_v15 = vsel %vm960_vm8, %v950_v53, %v2962_v21  ;;  %v941_v7 = vsel %vm940_vm11, %v2341_v2, %v937_v32 }
 0x24c   : > { %v946_v37 = vsel %vm943_vm12, %v945_v52, %v941_v7  ;;  %v1240_v7 = vstv %s1239_s14  ;;  %s2180_s14 = sshll.u32 %s2797_s9, 3  ;;  %s2235_s9 = sshll.u32 %s2949_s12, 5 }
 0x24d   : > { %s1543_s29 = scalar_lea.vmem %s2612_s18, %s2235_s9 }
 0x251   : > { %v2345_v61 = vpop.eup %2344 }
 0x252   : > { %v952_v0 = vmul.f32 %v2345_v61, %v946_v37  ;;  %v2426_v61 = vld [vmem:[%s3255_s0] sm:$0xff] }
 0x253   : > { %vm1241_vm13 = vcmp.lt.s32.totalorder %v1240_v7, %v2426_v61 }
 0x254   : > { %v961_v57 = vsel %vm960_vm8, %v952_v0, 0.0  ;;  %v3019_v1 = vsel %vm960_vm8, %v952_v0, %v2971_v36  ;;  %v972_v36 = vld [vmem:[%s3057_s22] sm:$0xff]  ;;  %v1242_v0 = vsel %vm1241_vm13, 1, %v2484_v20  ;;  %s1257_s22 = scalar_lea.vmem %s2612_s18, %s2233_s19  ;;  %s2186_s18 = sshll.u32 %s2949_s12, 3 }
 0x255   : > { %964 = vst [vmem:[%s963_s30] sm:$0xff] %v961_v57  ;;  %v976_v21 = vpack.c.bf16 %v3019_v1, %v3019_v1  ;;  %v1383_v57 = vstv %s1382_s15  ;;  %1244 = vperm.xlu2 %2297, %v1242_v0   ;;  %s1249_s30 = scalar_lea.vmem %s2614_s11, %s2168_s27 [#allocation4]  ;;  %s1535_s15 = scalar_lea.vmem %s2614_s11, %s2180_s14 [#allocation4] }
 0x256   : > { %vm1384_vm14 = vcmp.lt.s32.totalorder %v1383_v57, %v2426_v61  ;;  %s1678_s24 = scalar_lea.vmem %s2614_s11, %s2186_s18 [#allocation4] }
 0x257   : > { %985 = vmatmul.bf16.vlgmr.msrb.gmra.mxu0 %v976_v21  ;;  %998 = vmatmul.bf16.vlgmr.msrb.gmra.mxu1 %v976_v21 }
 0x258   : > { %1011 = vmatmul.bf16.vlgmr.msrb.gmra.mxu2 %v976_v21  ;;  %1024 = vmatmul.bf16.vlgmr.msrb.gmra.mxu3 %v976_v21 }
 0x259   : > { %1263 = vmatpush.bf16.msrb.mxu0 %v2620_v4  ;;  %1276 = vmatpush.bf16.msrb.mxu1 %v2625_v8 }
 0x25a   : > { %1289 = vmatpush.bf16.msrb.mxu2 %v2647_v22  ;;  %1302 = vmatpush.bf16.msrb.mxu3 %v2627_v9 }
 0x25d   : > { %1264 = vmatpush.bf16.msrb.mxu0 %v2633_v13  ;;  %1277 = vmatpush.bf16.msrb.mxu1 %v2640_v17 }
 0x25e   : > { %1290 = vmatpush.bf16.msrb.mxu2 %v2668_v35  ;;  %1303 = vmatpush.bf16.msrb.mxu3 %v2642_v18 }
 0x261   : > { %1265 = vmatpush.bf16.msrb.mxu0 %v2657_v29  ;;  %1278 = vmatpush.bf16.msrb.mxu1 %v2664_v33 }
 0x262   : > { %1291 = vmatpush.bf16.msrb.mxu2 %v2680_v43  ;;  %1304 = vmatpush.bf16.msrb.mxu3 %v2666_v34 }
 0x265   : > { %1266 = vmatpush.bf16.msrb.mxu0 %v2678_v42  ;;  %1279 = vmatpush.bf16.msrb.mxu1 %v2686_v46 }
 0x266   : > { %1292 = vmatpush.bf16.msrb.mxu2 %v2700_v55  ;;  %1305 = vmatpush.bf16.msrb.mxu3 %v2688_v47 }
 0x269   : > { %1267 = vmatpush.bf16.msrb.mxu0 %v2698_v54  ;;  %1280 = vmatpush.bf16.msrb.mxu1 %v2706_v58 }
 0x26a   : > { %1293 = vmatpush.bf16.msrb.mxu2 %v2721_v5  ;;  %1306 = vmatpush.bf16.msrb.mxu3 %v2708_v59 }
 0x26d   : > { %1268 = vmatpush.bf16.msrb.mxu0 %v2719_v3  ;;  %1281 = vmatpush.bf16.msrb.mxu1 %v2728_v11 }
 0x26e   : > { %1294 = vmatpush.bf16.msrb.mxu2 %v2751_v24  ;;  %1307 = vmatpush.bf16.msrb.mxu3 %v2730_v12 }
 0x271   : > { %1269 = vmatpush.bf16.msrb.mxu0 %v2749_v23  ;;  %1282 = vmatpush.bf16.msrb.mxu1 %v2763_v27 }
 0x272   : > { %1295 = vmatpush.bf16.msrb.mxu2 %v2784_v45  ;;  %1308 = vmatpush.bf16.msrb.mxu3 %v2765_v28 }
 0x275   : > { %1270 = vmatpush.bf16.msrb.mxu0 %v2780_v41  ;;  %1283 = vmatpush.bf16.msrb.mxu1 %v2788_v48 }
 0x276   : > { %1296 = vmatpush.bf16.msrb.mxu2 %v2804_v56  ;;  %1309 = vmatpush.bf16.msrb.mxu3 %v2790_v49 }
 0x2d4   : > { %v986_v2 = vpop.f32.mrf.mxu0  ;;  %v999_v10 = vpop.f32.mrf.mxu1 }
 0x2d5   : > { %v1029_v6 = vadd.f32 %v986_v2, %v972_v36  ;;  %v1030_v16 = vadd.f32 %v999_v10, %v973_v38 }
 0x2d7   : > { %v2158_v62 = vmul.f32 -1.442695, %v1029_v6  ;;  %v2159_v14 = vmul.f32 -1.442695, %v1030_v16 }
 0x2d9   : > { %2346 = vpow2.f32 %v2158_v62 }
 0x2da   : > { %2348 = vpow2.f32 %v2159_v14 }
 0x2db   : > { %v1012_v19 = vpop.f32.mrf.mxu2  ;;  %v1025_v25 = vpop.f32.mrf.mxu3 }
 0x2dc   : > { %v1032_v44 = vadd.f32 %v1025_v25, %v975_v63  ;;  %v988_v51 = vpop.f32.mrf.mxu0  ;;  %v1001_v30 = vpop.f32.mrf.mxu1  ;;  %v1031_v36 = vadd.f32 %v1012_v19, %v974_v50 }
 0x2de   : > { %v2160_v31 = vmul.f32 -1.442695, %v1032_v44  ;;  %v1385_v44 = vsel %vm1384_vm14, 1, %v2484_v20 }
 0x2df   : > { %v2347_v40 = vpop.eup %2346  ;;  %1387 = vperm.xlu2 %2297, %v1385_v44  }
 0x2e0   : > { %v2349_v60 = vpop.eup %2348  ;;  %v1036_v26 = vadd.f32 1.0, %v2347_v40  ;;  %2350 = vpow2.f32 %v2160_v31 }
 0x2e1   : > { %v1055_v53 = vadd.f32 1.0, %v2349_v60 }
 0x2e2   : > { %2352 = vrcp.f32 %v1036_v26  ;;  %v1046_v62 = vand.u32 2147483647, %v1036_v26  ;;  %v1048_v14 = vand.u32 2147483648, %v1036_v26  ;;  %vm1042_vm1 = vweird.f32 %v1036_v26 }
 0x2e3   : > { %2354 = vrcp.f32 %v1055_v53  ;;  %v1014_v32 = vpop.f32.mrf.mxu2  ;;  %v1027_v39 = vpop.f32.mrf.mxu3  ;;  %v1067_v63 = vand.u32 2147483648, %v1055_v53  ;;  %v1065_v30 = vand.u32 2147483647, %v1055_v53  ;;  %vm1061_vm2 = vweird.f32 %v1055_v53 }
 0x2e4   : > { %v1049_v40 = vor.u32 1.1754944e-38, %v1048_v14  ;;  %vm1047_vm5 = vcmp.eq.f32.partialorder %v1046_v62, 8.507059e+37 }
 0x2e5   : > { %v1068_v39 = vor.u32 1.1754944e-38, %v1067_v63  ;;  %vm1066_vm6 = vcmp.eq.f32.partialorder %v1065_v30, 8.507059e+37 }
 0x2e6   : > { %v2351_v52 = vpop.eup %2350 }
 0x2e7   : > { %v1075_v37 = vadd.f32 1.0, %v2351_v52 }
 0x2e8   : > { %v2353_v21 = vpop.eup %2352 }
 0x2e9   : > { %v2355_v38 = vpop.eup %2354  ;;  %v1038_v2 = vmul.f32 %v2353_v21, %v1036_v26  ;;  %2356 = vrcp.f32 %v1075_v37  ;;  %vm1043_vm15 = vweird.f32 %v2353_v21  ;;  %vm1081_vm9 = vweird.f32 %v1075_v37 }
 0x2ea   : > { %v1057_v10 = vmul.f32 %v2355_v38, %v1055_v53  ;;  %2358 = vtanh.f32 %v1031_v36  ;;  %vm1062_vm0 = vweird.f32 %v2355_v38  ;;  %vm1044_vm3 = vmor %vm1042_vm1, %vm1043_vm15  ;;  %v1102_v36 = vpop.permute.xlu1 %1101 }
 0x2eb   : > { %v1039_v6 = vsub.f32 1.0, %v1038_v2  ;;  %vm1063_vm4 = vmor %vm1061_vm2, %vm1062_vm0  ;;  %vm1103_vm7 = vcmp.eq.s32.totalorder %v1102_v36, 1 }
 0x2ec   : > { %v1058_v16 = vsub.f32 1.0, %v1057_v10 }
 0x2ed   : > { %v1040_v25 = vmul.f32 %v2353_v21, %v1039_v6 }
 0x2ee   : > { %v1059_v51 = vmul.f32 %v2355_v38, %v1058_v16 }
 0x2ef   : > { %v2357_v19 = vpop.eup %2356  ;;  %v1041_v31 = vadd.f32 %v2353_v21, %v1040_v25 }
 0x2f0   : > { %v1060_v60 = vadd.f32 %v2355_v38, %v1059_v51  ;;  %v1077_v32 = vmul.f32 %v2357_v19, %v1075_v37  ;;  %v2359_v7 = vpop.eup %2358  ;;  %vm1082_vm8 = vweird.f32 %v2357_v19 }
 0x2f1   : > { %v1045_v50 = vsel %vm1044_vm3, %v2353_v21, %v1041_v31  ;;  %v1087_v21 = vand.u32 2147483648, %v1075_v37  ;;  %vm1083_vm10 = vmor %vm1081_vm9, %vm1082_vm8 }
 0x2f2   : > { %v1050_v52 = vsel %vm1047_vm5, %v1049_v40, %v1045_v50  ;;  %v1064_v61 = vsel %vm1063_vm4, %v2355_v38, %v1060_v60  ;;  %v1078_v20 = vsub.f32 1.0, %v1077_v32  ;;  %v1085_v38 = vand.u32 2147483647, %v1075_v37  ;;  %v1116_v37 = vld [vmem:[%s1114_s17 + $0x8] sm:$0xff] }
 0x2f3   : > { %v1069_v0 = vsel %vm1066_vm6, %v1068_v39, %v1064_v61  ;;  %v1092_v57 = vmul.f32 %v2359_v7, %v1050_v52  ;;  %v1088_v62 = vor.u32 1.1754944e-38, %v1087_v21  ;;  %v1118_v39 = vld [vmem:[%s1114_s17 + $0x18] sm:$0xff]  ;;  %v1117_v21 = vld [vmem:[%s1114_s17 + $0x10] sm:$0xff] }
 0x2f4   : > { %v1091_v26 = vmul.f32 %v1069_v0, %v3012_v15  ;;  %v1079_v53 = vmul.f32 %v2357_v19, %v1078_v20  ;;  %vm1086_vm11 = vcmp.eq.f32.partialorder %v1085_v38, 8.507059e+37 }
 0x2f6   : > { %v1093_v2 = vadd.f32 %v1092_v57, %v1091_v26  ;;  %v1080_v10 = vadd.f32 %v2357_v19, %v1079_v53 }
 0x2f8   : > { %2360 = vtanh.f32 %v1093_v2  ;;  %v3083_v6 = vsel %vm1103_vm7, %v1093_v2, %v3012_v15  ;;  %v1084_v16 = vsel %vm1083_vm10, %v2357_v19, %v1080_v10 }
 0x2f9   : > { %v1089_v63 = vsel %vm1086_vm11, %v1088_v62, %v1084_v16 }
 0x2fe   : > { %v2361_v14 = vpop.eup %2360 }
 0x2ff   : > { %v1095_v25 = vmul.f32 %v2361_v14, %v1089_v63 }
 0x301   : > { %v1104_v44 = vsel %vm1103_vm7, %v1095_v25, 0.0  ;;  %v3090_v51 = vsel %vm1103_vm7, %v1095_v25, %v3019_v1  ;;  %v1115_v1 = vld [vmem:[%s1114_s17] sm:$0xff] }
 0x302   : > { %v1119_v15 = vpack.c.bf16 %v3090_v51, %v3090_v51  ;;  %1107 = vst [vmem:[%s1106_s3] sm:$0xff] %v1104_v44 }
 0x304   : > { %1128 = vmatmul.bf16.vlgmr.msra.gmra.mxu0 %v1119_v15  ;;  %1141 = vmatmul.bf16.vlgmr.msra.gmra.mxu1 %v1119_v15 }
 0x305   : > { %1154 = vmatmul.bf16.vlgmr.msra.gmra.mxu2 %v1119_v15  ;;  %1167 = vmatmul.bf16.vlgmr.msra.gmra.mxu3 %v1119_v15 }
 0x306   : > { %1406 = vmatpush.bf16.msra.mxu0 %v2620_v4  ;;  %1419 = vmatpush.bf16.msra.mxu1 %v2625_v8 }
 0x307   : > { %1432 = vmatpush.bf16.msra.mxu2 %v2647_v22  ;;  %1445 = vmatpush.bf16.msra.mxu3 %v2627_v9 }
 0x30a   : > { %1407 = vmatpush.bf16.msra.mxu0 %v2633_v13  ;;  %1420 = vmatpush.bf16.msra.mxu1 %v2640_v17 }
 0x30b   : > { %1433 = vmatpush.bf16.msra.mxu2 %v2668_v35  ;;  %1446 = vmatpush.bf16.msra.mxu3 %v2642_v18 }
 0x30e   : > { %1408 = vmatpush.bf16.msra.mxu0 %v2657_v29  ;;  %1421 = vmatpush.bf16.msra.mxu1 %v2664_v33 }
 0x30f   : > { %1434 = vmatpush.bf16.msra.mxu2 %v2680_v43  ;;  %1447 = vmatpush.bf16.msra.mxu3 %v2666_v34 }
 0x312   : > { %1409 = vmatpush.bf16.msra.mxu0 %v2678_v42  ;;  %1422 = vmatpush.bf16.msra.mxu1 %v2686_v46 }
 0x313   : > { %1435 = vmatpush.bf16.msra.mxu2 %v2700_v55  ;;  %1448 = vmatpush.bf16.msra.mxu3 %v2688_v47 }
 0x316   : > { %1410 = vmatpush.bf16.msra.mxu0 %v2698_v54  ;;  %1423 = vmatpush.bf16.msra.mxu1 %v2706_v58 }
 0x317   : > { %1436 = vmatpush.bf16.msra.mxu2 %v2721_v5  ;;  %1449 = vmatpush.bf16.msra.mxu3 %v2708_v59 }
 0x31a   : > { %1411 = vmatpush.bf16.msra.mxu0 %v2719_v3  ;;  %1424 = vmatpush.bf16.msra.mxu1 %v2728_v11 }
 0x31b   : > { %1437 = vmatpush.bf16.msra.mxu2 %v2751_v24  ;;  %1450 = vmatpush.bf16.msra.mxu3 %v2730_v12 }
 0x31e   : > { %1412 = vmatpush.bf16.msra.mxu0 %v2749_v23  ;;  %1425 = vmatpush.bf16.msra.mxu1 %v2763_v27 }
 0x31f   : > { %1438 = vmatpush.bf16.msra.mxu2 %v2784_v45  ;;  %1451 = vmatpush.bf16.msra.mxu3 %v2765_v28 }
 0x322   : > { %1413 = vmatpush.bf16.msra.mxu0 %v2780_v41  ;;  %1426 = vmatpush.bf16.msra.mxu1 %v2788_v48 }
 0x323   : > { %1439 = vmatpush.bf16.msra.mxu2 %v2804_v56  ;;  %1452 = vmatpush.bf16.msra.mxu3 %v2790_v49 }
 0x381   : > { %v1129_v30 = vpop.f32.mrf.mxu0  ;;  %v1142_v19 = vpop.f32.mrf.mxu1 }
 0x382   : > { %v1172_v31 = vadd.f32 %v1129_v30, %v1115_v1  ;;  %v1173_v40 = vadd.f32 %v1142_v19, %v1116_v37 }
 0x384   : > { %v2165_v60 = vmul.f32 -1.442695, %v1172_v31  ;;  %v2166_v32 = vmul.f32 -1.442695, %v1173_v40 }
 0x386   : > { %2362 = vpow2.f32 %v2165_v60 }
 0x387   : > { %2364 = vpow2.f32 %v2166_v32 }
 0x388   : > { %v1155_v50 = vpop.f32.mrf.mxu2  ;;  %v1168_v7 = vpop.f32.mrf.mxu3 }
 0x389   : > { %v1175_v52 = vadd.f32 %v1168_v7, %v1118_v39  ;;  %v1131_v61 = vpop.f32.mrf.mxu0  ;;  %v1144_v20 = vpop.f32.mrf.mxu1  ;;  %v1174_v14 = vadd.f32 %v1155_v50, %v1117_v21 }
 0x38b   : > { %v2167_v0 = vmul.f32 -1.442695, %v1175_v52 }
 0x38c   : > { %v2363_v57 = vpop.eup %2362 }
 0x38d   : > { %v2365_v26 = vpop.eup %2364  ;;  %v1179_v53 = vadd.f32 1.0, %v2363_v57  ;;  %2366 = vpow2.f32 %v2167_v0 }
 0x38e   : > { %v1198_v36 = vadd.f32 1.0, %v2365_v26 }
 0x38f   : > { %2368 = vrcp.f32 %v1179_v53  ;;  %v1191_v37 = vand.u32 2147483648, %v1179_v53  ;;  %v1189_v19 = vand.u32 2147483647, %v1179_v53  ;;  %vm1185_vm14 = vweird.f32 %v1179_v53 }
 0x390   : > { %2370 = vrcp.f32 %v1198_v36  ;;  %v1157_v2 = vpop.f32.mrf.mxu2  ;;  %v1170_v10 = vpop.f32.mrf.mxu3  ;;  %v1210_v31 = vand.u32 2147483648, %v1198_v36  ;;  %v1208_v60 = vand.u32 2147483647, %v1198_v36  ;;  %vm1204_vm0 = vweird.f32 %v1198_v36 }
 0x391   : > { %v1192_v50 = vor.u32 1.1754944e-38, %v1191_v37  ;;  %vm1190_vm1 = vcmp.eq.f32.partialorder %v1189_v19, 8.507059e+37  ;;  %v1245_v2 = vpop.permute.xlu2 %1244 }
 0x392   : > { %v1211_v20 = vor.u32 1.1754944e-38, %v1210_v31  ;;  %vm1209_vm3 = vcmp.eq.f32.partialorder %v1208_v60, 8.507059e+37  ;;  %vm1246_vm4 = vcmp.eq.s32.totalorder %v1245_v2, 1 }
 0x393   : > { %v2367_v38 = vpop.eup %2366 }
 0x394   : > { %v1218_v16 = vadd.f32 1.0, %v2367_v38 }
 0x395   : > { %v2369_v62 = vpop.eup %2368 }
 0x396   : > { %v2371_v63 = vpop.eup %2370  ;;  %v1181_v25 = vmul.f32 %v2369_v62, %v1179_v53  ;;  %2372 = vrcp.f32 %v1218_v16  ;;  %vm1186_vm12 = vweird.f32 %v2369_v62  ;;  %vm1224_vm6 = vweird.f32 %v1218_v16 }
 0x397   : > { %v1200_v44 = vmul.f32 %v2371_v63, %v1198_v36  ;;  %2374 = vtanh.f32 %v1174_v14  ;;  %vm1205_vm13 = vweird.f32 %v2371_v63  ;;  %vm1187_vm15 = vmor %vm1185_vm14, %vm1186_vm12 }
 0x398   : > { %v1182_v15 = vsub.f32 1.0, %v1181_v25  ;;  %vm1206_vm2 = vmor %vm1204_vm0, %vm1205_vm13 }
 0x399   : > { %v1201_v1 = vsub.f32 1.0, %v1200_v44 }
 0x39a   : > { %v1183_v30 = vmul.f32 %v2369_v62, %v1182_v15 }
 0x39b   : > { %v1202_v40 = vmul.f32 %v2371_v63, %v1201_v1 }
 0x39c   : > { %v2373_v32 = vpop.eup %2372  ;;  %v1184_v39 = vadd.f32 %v2369_v62, %v1183_v30 }
 0x39d   : > { %v1220_v7 = vmul.f32 %v2373_v32, %v1218_v16  ;;  %v1203_v52 = vadd.f32 %v2371_v63, %v1202_v40  ;;  %v2375_v0 = vpop.eup %2374  ;;  %vm1225_vm5 = vweird.f32 %v2373_v32 }
 0x39e   : > { %v1188_v61 = vsel %vm1187_vm15, %v2369_v62, %v1184_v39  ;;  %v1230_v62 = vand.u32 2147483648, %v1218_v16  ;;  %vm1226_vm7 = vmor %vm1224_vm6, %vm1225_vm5 }
 0x39f   : > { %v1193_v57 = vsel %vm1190_vm1, %v1192_v50, %v1188_v61  ;;  %v1221_v26 = vsub.f32 1.0, %v1220_v7  ;;  %v1207_v10 = vsel %vm1206_vm2, %v2371_v63, %v1203_v52  ;;  %v1228_v63 = vand.u32 2147483647, %v1218_v16 }
 0x3a0   : > { %v1235_v21 = vmul.f32 %v2375_v0, %v1193_v57  ;;  %v1212_v38 = vsel %vm1209_vm3, %v1211_v20, %v1207_v10  ;;  %v1231_v1 = vor.u32 1.1754944e-38, %v1230_v62 }
 0x3a1   : > { %v1222_v14 = vmul.f32 %v2373_v32, %v1221_v26  ;;  %v1234_v53 = vmul.f32 %v1212_v38, %v3083_v6  ;;  %vm1229_vm8 = vcmp.eq.f32.partialorder %v1228_v63, 8.507059e+37 }
 0x3a3   : > { %v1236_v25 = vadd.f32 %v1235_v21, %v1234_v53  ;;  %v1223_v36 = vadd.f32 %v2373_v32, %v1222_v14  ;;  %v1388_v53 = vpop.permute.xlu2 %1387 }
 0x3a4   : > { %vm1389_vm1 = vcmp.eq.s32.totalorder %v1388_v53, 1 }
 0x3a5   : > { %2376 = vtanh.f32 %v1236_v25  ;;  %v3131_v44 = vsel %vm1246_vm4, %v1236_v25, %v3083_v6  ;;  %v1227_v15 = vsel %vm1226_vm7, %v2373_v32, %v1223_v36 }
 0x3a6   : > { %v1232_v30 = vsel %vm1229_vm8, %v1231_v1, %v1227_v15 }
 0x3ab   : > { %v2377_v37 = vpop.eup %2376 }
 0x3ac   : > { %v1238_v19 = vmul.f32 %v2377_v37, %v1232_v30 }
 0x3ae   : > { %v1247_v31 = vsel %vm1246_vm4, %v1238_v19, 0.0  ;;  %v3138_v40 = vsel %vm1246_vm4, %v1238_v19, %v3090_v51 }
 0x3af   : > { %1250 = vst [vmem:[%s1249_s30] sm:$0xff] %v1247_v31  ;;  %v1262_v6 = vpack.c.bf16 %v3138_v40, %v3138_v40 }
 0x3b1   : > { %1271 = vmatmul.bf16.vlgmr.msrb.gmra.mxu0 %v1262_v6  ;;  %1284 = vmatmul.bf16.vlgmr.msrb.gmra.mxu1 %v1262_v6 }
 0x3b2   : > { %1297 = vmatmul.bf16.vlgmr.msrb.gmra.mxu2 %v1262_v6  ;;  %1310 = vmatmul.bf16.vlgmr.msrb.gmra.mxu3 %v1262_v6 }
 0x3b3   : > { %1549 = vmatpush.bf16.msrb.mxu0 %v2620_v4  ;;  %1562 = vmatpush.bf16.msrb.mxu1 %v2625_v8  ;;  %v1258_v4 = vld [vmem:[%s1257_s22] sm:$0xff]  ;;  %v1259_v8 = vld [vmem:[%s1257_s22 + $0x8] sm:$0xff] }
 0x3b4   : > { %1575 = vmatpush.bf16.msrb.mxu2 %v2647_v22  ;;  %1588 = vmatpush.bf16.msrb.mxu3 %v2627_v9 }
 0x3b7   : > { %1550 = vmatpush.bf16.msrb.mxu0 %v2633_v13  ;;  %1563 = vmatpush.bf16.msrb.mxu1 %v2640_v17 }
 0x3b8   : > { %1576 = vmatpush.bf16.msrb.mxu2 %v2668_v35  ;;  %1589 = vmatpush.bf16.msrb.mxu3 %v2642_v18 }
 0x3bb   : > { %1551 = vmatpush.bf16.msrb.mxu0 %v2657_v29  ;;  %1564 = vmatpush.bf16.msrb.mxu1 %v2664_v33  ;;  %v1261_v33 = vld [vmem:[%s1257_s22 + $0x18] sm:$0xff] }
 0x3bc   : > { %1577 = vmatpush.bf16.msrb.mxu2 %v2680_v43  ;;  %1590 = vmatpush.bf16.msrb.mxu3 %v2666_v34 }
 0x3bf   : > { %1552 = vmatpush.bf16.msrb.mxu0 %v2678_v42  ;;  %1565 = vmatpush.bf16.msrb.mxu1 %v2686_v46 }
 0x3c0   : > { %1578 = vmatpush.bf16.msrb.mxu2 %v2700_v55  ;;  %1591 = vmatpush.bf16.msrb.mxu3 %v2688_v47 }
 0x3c3   : > { %1553 = vmatpush.bf16.msrb.mxu0 %v2698_v54  ;;  %1566 = vmatpush.bf16.msrb.mxu1 %v2706_v58 }
 0x3c4   : > { %1579 = vmatpush.bf16.msrb.mxu2 %v2721_v5  ;;  %1592 = vmatpush.bf16.msrb.mxu3 %v2708_v59 }
 0x3c7   : > { %1554 = vmatpush.bf16.msrb.mxu0 %v2719_v3  ;;  %1567 = vmatpush.bf16.msrb.mxu1 %v2728_v11  ;;  %v1260_v11 = vld [vmem:[%s1257_s22 + $0x10] sm:$0xff] }
 0x3c8   : > { %1580 = vmatpush.bf16.msrb.mxu2 %v2751_v24  ;;  %1593 = vmatpush.bf16.msrb.mxu3 %v2730_v12 }
 0x3cb   : > { %1555 = vmatpush.bf16.msrb.mxu0 %v2749_v23  ;;  %1568 = vmatpush.bf16.msrb.mxu1 %v2763_v27 }
 0x3cc   : > { %1581 = vmatpush.bf16.msrb.mxu2 %v2784_v45  ;;  %1594 = vmatpush.bf16.msrb.mxu3 %v2765_v28 }
 0x3cf   : > { %1556 = vmatpush.bf16.msrb.mxu0 %v2780_v41  ;;  %1569 = vmatpush.bf16.msrb.mxu1 %v2788_v48 }
 0x3d0   : > { %1582 = vmatpush.bf16.msrb.mxu2 %v2804_v56  ;;  %1595 = vmatpush.bf16.msrb.mxu3 %v2790_v49 }
 0x42e   : > { %v1272_v9 = vpop.f32.mrf.mxu0  ;;  %v1285_v13 = vpop.f32.mrf.mxu1 }
 0x42f   : > { %v1315_v17 = vadd.f32 %v1272_v9, %v1258_v4  ;;  %v1316_v18 = vadd.f32 %v1285_v13, %v1259_v8  ;;  %v1401_v13 = vld [vmem:[%s1400_s13] sm:$0xff] }
 0x431   : > { %v2171_v22 = vmul.f32 -1.442695, %v1315_v17  ;;  %v2172_v29 = vmul.f32 -1.442695, %v1316_v18  ;;  %v1402_v17 = vld [vmem:[%s1400_s13 + $0x8] sm:$0xff] }
 0x433   : > { %2378 = vpow2.f32 %v2171_v22 }
 0x434   : > { %2380 = vpow2.f32 %v2172_v29 }
 0x435   : > { %v1298_v34 = vpop.f32.mrf.mxu2  ;;  %v1311_v35 = vpop.f32.mrf.mxu3 }
 0x436   : > { %v1318_v42 = vadd.f32 %v1311_v35, %v1261_v33  ;;  %v1274_v43 = vpop.f32.mrf.mxu0  ;;  %v1287_v46 = vpop.f32.mrf.mxu1  ;;  %v1317_v27 = vadd.f32 %v1298_v34, %v1260_v11 }
 0x438   : > { %v2173_v47 = vmul.f32 -1.442695, %v1318_v42 }
 0x439   : > { %v2379_v54 = vpop.eup %2378 }
 0x43a   : > { %v2381_v55 = vpop.eup %2380  ;;  %v1322_v58 = vadd.f32 1.0, %v2379_v54  ;;  %2382 = vpow2.f32 %v2173_v47 }
 0x43b   : > { %v1341_v59 = vadd.f32 1.0, %v2381_v55 }
 0x43c   : > { %2384 = vrcp.f32 %v1322_v58  ;;  %v1334_v56 = vand.u32 2147483648, %v1322_v58  ;;  %v1332_v60 = vand.u32 2147483647, %v1322_v58  ;;  %vm1328_vm11 = vweird.f32 %v1322_v58 }
 0x43d   : > { %2386 = vrcp.f32 %v1341_v59  ;;  %v1300_v3 = vpop.f32.mrf.mxu2  ;;  %v1313_v5 = vpop.f32.mrf.mxu3  ;;  %v1353_v51 = vand.u32 2147483648, %v1341_v59  ;;  %v1351_v39 = vand.u32 2147483647, %v1341_v59  ;;  %vm1347_vm12 = vweird.f32 %v1341_v59 }
 0x43e   : > { %v1335_v52 = vor.u32 1.1754944e-38, %v1334_v56  ;;  %vm1333_vm15 = vcmp.eq.f32.partialorder %v1332_v60, 8.507059e+37 }
 0x43f   : > { %v1354_v0 = vor.u32 1.1754944e-38, %v1353_v51  ;;  %vm1352_vm0 = vcmp.eq.f32.partialorder %v1351_v39, 8.507059e+37 }
 0x440   : > { %v2383_v12 = vpop.eup %2382 }
 0x441   : > { %v1361_v23 = vadd.f32 1.0, %v2383_v12 }
 0x442   : > { %v2385_v24 = vpop.eup %2384 }
 0x443   : > { %v2387_v28 = vpop.eup %2386  ;;  %v1324_v41 = vmul.f32 %v2385_v24, %v1322_v58  ;;  %2388 = vrcp.f32 %v1361_v23  ;;  %vm1329_vm9 = vweird.f32 %v2385_v24  ;;  %v1373_v15 = vand.u32 2147483648, %v1361_v23 }
 0x444   : > { %v1343_v45 = vmul.f32 %v2387_v28, %v1341_v59  ;;  %2390 = vtanh.f32 %v1317_v27  ;;  %vm1348_vm10 = vweird.f32 %v2387_v28  ;;  %vm1330_vm13 = vmor %vm1328_vm11, %vm1329_vm9  ;;  %vm1367_vm3 = vweird.f32 %v1361_v23 }
 0x445   : > { %v1325_v48 = vsub.f32 1.0, %v1324_v41  ;;  %vm1349_vm14 = vmor %vm1347_vm12, %vm1348_vm10  ;;  %v1371_v37 = vand.u32 2147483647, %v1361_v23  ;;  %v1374_v19 = vor.u32 1.1754944e-38, %v1373_v15 }
 0x446   : > { %v1344_v49 = vsub.f32 1.0, %v1343_v45 }
 0x447   : > { %v1326_v16 = vmul.f32 %v2385_v24, %v1325_v48  ;;  %vm1372_vm5 = vcmp.eq.f32.partialorder %v1371_v37, 8.507059e+37 }
 0x448   : > { %v1345_v32 = vmul.f32 %v2387_v28, %v1344_v49 }
 0x449   : > { %v2389_v50 = vpop.eup %2388  ;;  %v1327_v7 = vadd.f32 %v2385_v24, %v1326_v16 }
 0x44a   : > { %v1346_v61 = vadd.f32 %v2387_v28, %v1345_v32  ;;  %v1363_v20 = vmul.f32 %v2389_v50, %v1361_v23  ;;  %v2391_v26 = vpop.eup %2390  ;;  %vm1368_vm2 = vweird.f32 %v2389_v50  ;;  %v1403_v23 = vld [vmem:[%s1400_s13 + $0x10] sm:$0xff] }
 0x44b   : > { %v1331_v57 = vsel %vm1330_vm13, %v2385_v24, %v1327_v7  ;;  %vm1369_vm4 = vmor %vm1367_vm3, %vm1368_vm2 }
 0x44c   : > { %v1336_v2 = vsel %vm1333_vm15, %v1335_v52, %v1331_v57  ;;  %v1350_v10 = vsel %vm1349_vm14, %v2387_v28, %v1346_v61  ;;  %v1364_v21 = vsub.f32 1.0, %v1363_v20 }
 0x44d   : > { %v1355_v38 = vsel %vm1352_vm0, %v1354_v0, %v1350_v10  ;;  %v1378_v14 = vmul.f32 %v2391_v26, %v1336_v2 }
 0x44e   : > { %v1377_v25 = vmul.f32 %v1355_v38, %v3131_v44  ;;  %v1365_v36 = vmul.f32 %v2389_v50, %v1364_v21 }
 0x450   : > { %v1379_v62 = vadd.f32 %v1378_v14, %v1377_v25  ;;  %v1366_v63 = vadd.f32 %v2389_v50, %v1365_v36  ;;  %v1531_v36 = vpop.permute.xlu0 %1530 }
 0x451   : > { %vm1532_vm14 = vcmp.eq.s32.totalorder %v1531_v36, 1 }
 0x452   : > { %2392 = vtanh.f32 %v1379_v62  ;;  %v3179_v1 = vsel %vm1389_vm1, %v1379_v62, %v3131_v44  ;;  %v1370_v30 = vsel %vm1369_vm4, %v2389_v50, %v1366_v63 }
 0x453   : > { %v1375_v6 = vsel %vm1372_vm5, %v1374_v19, %v1370_v30 }
 0x458   : > { %v2393_v31 = vpop.eup %2392 }
 0x459   : > { %v1381_v4 = vmul.f32 %v2393_v31, %v1375_v6 }
 0x45b   : > { %v1390_v8 = vsel %vm1389_vm1, %v1381_v4, 0.0  ;;  %v3186_v9 = vsel %vm1389_vm1, %v1381_v4, %v3138_v40  ;;  %v1404_v40 = vld [vmem:[%s1400_s13 + $0x18] sm:$0xff] }
 0x45c   : > { %1393 = vst [vmem:[%s1392_s28] sm:$0xff] %v1390_v8  ;;  %v1405_v44 = vpack.c.bf16 %v3186_v9, %v3186_v9 }
 0x45e   : > { %1414 = vmatmul.bf16.vlgmr.msra.gmra.mxu0 %v1405_v44  ;;  %1427 = vmatmul.bf16.vlgmr.msra.gmra.mxu1 %v1405_v44 }
 0x45f   : > { %1440 = vmatmul.bf16.vlgmr.msra.gmra.mxu2 %v1405_v44  ;;  %1453 = vmatmul.bf16.vlgmr.msra.gmra.mxu3 %v1405_v44 }
 0x4db   : > { %v1415_v18 = vpop.f32.mrf.mxu0  ;;  %v1428_v22 = vpop.f32.mrf.mxu1 }
 0x4dc   : > { %v1458_v29 = vadd.f32 %v1415_v18, %v1401_v13  ;;  %v1459_v33 = vadd.f32 %v1428_v22, %v1402_v17  ;;  %v1544_v22 = vld [vmem:[%s1543_s29] sm:$0xff] }
 0x4de   : > { %v2177_v34 = vmul.f32 -1.442695, %v1458_v29  ;;  %v2178_v35 = vmul.f32 -1.442695, %v1459_v33  ;;  %v1545_v29 = vld [vmem:[%s1543_s29 + $0x8] sm:$0xff] }
 0x4e0   : > { %2394 = vpow2.f32 %v2177_v34 }
 0x4e1   : > { %2396 = vpow2.f32 %v2178_v35 }
 0x4e2   : > { %v1441_v42 = vpop.f32.mrf.mxu2  ;;  %v1454_v43 = vpop.f32.mrf.mxu3 }
 0x4e3   : > { %v1461_v46 = vadd.f32 %v1454_v43, %v1404_v40  ;;  %v1417_v47 = vpop.f32.mrf.mxu0  ;;  %v1430_v54 = vpop.f32.mrf.mxu1  ;;  %v1460_v41 = vadd.f32 %v1441_v42, %v1403_v23 }
 0x4e5   : > { %v2179_v55 = vmul.f32 -1.442695, %v1461_v46 }
 0x4e6   : > { %v2395_v58 = vpop.eup %2394 }
 0x4e7   : > { %v2397_v59 = vpop.eup %2396  ;;  %v1465_v3 = vadd.f32 1.0, %v2395_v58  ;;  %2398 = vpow2.f32 %v2179_v55 }
 0x4e8   : > { %v1484_v5 = vadd.f32 1.0, %v2397_v59 }
 0x4e9   : > { %2400 = vrcp.f32 %v1465_v3  ;;  %v1477_v16 = vand.u32 2147483648, %v1465_v3  ;;  %v1475_v39 = vand.u32 2147483647, %v1465_v3  ;;  %vm1471_vm8 = vweird.f32 %v1465_v3 }
 0x4ea   : > { %2402 = vrcp.f32 %v1484_v5  ;;  %v1443_v11 = vpop.f32.mrf.mxu2  ;;  %v1456_v12 = vpop.f32.mrf.mxu3  ;;  %v1496_v60 = vand.u32 2147483648, %v1484_v5  ;;  %v1494_v7 = vand.u32 2147483647, %v1484_v5  ;;  %vm1490_vm9 = vweird.f32 %v1484_v5 }
 0x4eb   : > { %v1478_v20 = vor.u32 1.1754944e-38, %v1477_v16  ;;  %vm1476_vm12 = vcmp.eq.f32.partialorder %v1475_v39, 8.507059e+37 }
 0x4ec   : > { %v1497_v26 = vor.u32 1.1754944e-38, %v1496_v60  ;;  %vm1495_vm13 = vcmp.eq.f32.partialorder %v1494_v7, 8.507059e+37 }
 0x4ed   : > { %v2399_v24 = vpop.eup %2398 }
 0x4ee   : > { %v1504_v27 = vadd.f32 1.0, %v2399_v24 }
 0x4ef   : > { %v2401_v28 = vpop.eup %2400 }
 0x4f0   : > { %v2403_v45 = vpop.eup %2402  ;;  %v1467_v48 = vmul.f32 %v2401_v28, %v1465_v3  ;;  %2404 = vrcp.f32 %v1504_v27  ;;  %vm1472_vm6 = vweird.f32 %v2401_v28  ;;  %v1516_v30 = vand.u32 2147483648, %v1504_v27 }
 0x4f1   : > { %v1486_v49 = vmul.f32 %v2403_v45, %v1484_v5  ;;  %2406 = vtanh.f32 %v1460_v41  ;;  %vm1491_vm7 = vweird.f32 %v2403_v45  ;;  %vm1473_vm10 = vmor %vm1471_vm8, %vm1472_vm6  ;;  %vm1510_vm0 = vweird.f32 %v1504_v27 }
 0x4f2   : > { %v1468_v56 = vsub.f32 1.0, %v1467_v48  ;;  %vm1492_vm11 = vmor %vm1490_vm9, %vm1491_vm7  ;;  %v1514_v31 = vand.u32 2147483647, %v1504_v27  ;;  %v1517_v4 = vor.u32 1.1754944e-38, %v1516_v30 }
 0x4f3   : > { %v1487_v51 = vsub.f32 1.0, %v1486_v49 }
 0x4f4   : > { %v1469_v32 = vmul.f32 %v2401_v28, %v1468_v56  ;;  %vm1515_vm2 = vcmp.eq.f32.partialorder %v1514_v31, 8.507059e+37 }
 0x4f5   : > { %v1488_v50 = vmul.f32 %v2403_v45, %v1487_v51 }
 0x4f6   : > { %v2405_v52 = vpop.eup %2404  ;;  %v1470_v61 = vadd.f32 %v2401_v28, %v1469_v32 }
 0x4f7   : > { %v1489_v0 = vadd.f32 %v2403_v45, %v1488_v50  ;;  %v1506_v57 = vmul.f32 %v2405_v52, %v1504_v27  ;;  %v2407_v10 = vpop.eup %2406  ;;  %vm1511_vm15 = vweird.f32 %v2405_v52  ;;  %v1546_v27 = vld [vmem:[%s1543_s29 + $0x10] sm:$0xff] }
 0x4f8   : > { %v1474_v2 = vsel %vm1473_vm10, %v2401_v28, %v1470_v61  ;;  %vm1512_vm1 = vmor %vm1510_vm0, %vm1511_vm15 }
 0x4f9   : > { %v1479_v21 = vsel %vm1476_vm12, %v1478_v20, %v1474_v2  ;;  %v1493_v38 = vsel %vm1492_vm11, %v2403_v45, %v1489_v0  ;;  %v1507_v14 = vsub.f32 1.0, %v1506_v57 }
 0x4fa   : > { %v1498_v53 = vsel %vm1495_vm13, %v1497_v26, %v1493_v38  ;;  %v1521_v25 = vmul.f32 %v2407_v10, %v1479_v21 }
 0x4fb   : > { %v1520_v62 = vmul.f32 %v1498_v53, %v3179_v1  ;;  %v1508_v63 = vmul.f32 %v2405_v52, %v1507_v14 }
 0x4fd   : > { %v1522_v15 = vadd.f32 %v1521_v25, %v1520_v62  ;;  %v1509_v37 = vadd.f32 %v2405_v52, %v1508_v63  ;;  %v1674_v63 = vpop.permute.xlu1 %1673 }
 0x4fe   : > { %vm1675_vm11 = vcmp.eq.s32.totalorder %v1674_v63, 1 }
 0x4ff   : > { %2408 = vtanh.f32 %v1522_v15  ;;  %v3195_v19 = vsel %vm1532_vm14, %v1522_v15, %v3179_v1  ;;  %v1513_v6 = vsel %vm1512_vm1, %v2405_v52, %v1509_v37 }
 0x500   : > { %v1518_v44 = vsel %vm1515_vm2, %v1517_v4, %v1513_v6 }
 0x505   : > { %v2409_v8 = vpop.eup %2408 }
 0x506   : > { %v1524_v13 = vmul.f32 %v2409_v8, %v1518_v44 }
 0x508   : > { %v1533_v17 = vsel %vm1532_vm14, %v1524_v13, 0.0  ;;  %v3202_v18 = vsel %vm1532_vm14, %v1524_v13, %v3186_v9  ;;  %v1547_v9 = vld [vmem:[%s1543_s29 + $0x18] sm:$0xff] }
 0x509   : > { %1536 = vst [vmem:[%s1535_s15] sm:$0xff] %v1533_v17  ;;  %v1548_v1 = vpack.c.bf16 %v3202_v18, %v3202_v18 }
 0x50b   : > { %1557 = vmatmul.bf16.vlgmr.msrb.gmra.mxu0 %v1548_v1  ;;  %1570 = vmatmul.bf16.vlgmr.msrb.gmra.mxu1 %v1548_v1 }
 0x50c   : > { %1583 = vmatmul.bf16.vlgmr.msrb.gmra.mxu2 %v1548_v1  ;;  %1596 = vmatmul.bf16.vlgmr.msrb.gmra.mxu3 %v1548_v1 }
 0x588   : > { %v1558_v33 = vpop.f32.mrf.mxu0  ;;  %v1571_v34 = vpop.f32.mrf.mxu1 }
 0x589   : > { %v1601_v35 = vadd.f32 %v1558_v33, %v1544_v22  ;;  %v1602_v40 = vadd.f32 %v1571_v34, %v1545_v29 }
 0x58b   : > { %v2183_v42 = vmul.f32 -1.442695, %v1601_v35  ;;  %v2184_v43 = vmul.f32 -1.442695, %v1602_v40 }
 0x58d   : > { %2410 = vpow2.f32 %v2183_v42 }
 0x58e   : > { %2412 = vpow2.f32 %v2184_v43 }
 0x58f   : > { %v1584_v46 = vpop.f32.mrf.mxu2  ;;  %v1597_v47 = vpop.f32.mrf.mxu3 }
 0x590   : > { %v1604_v54 = vadd.f32 %v1597_v47, %v1547_v9  ;;  %v1560_v55 = vpop.f32.mrf.mxu0  ;;  %v1573_v58 = vpop.f32.mrf.mxu1  ;;  %v1603_v48 = vadd.f32 %v1584_v46, %v1546_v27 }
 0x592   : > { %v2185_v59 = vmul.f32 -1.442695, %v1604_v54 }
 0x593   : > { %v2411_v3 = vpop.eup %2410 }
 0x594   : > { %v2413_v5 = vpop.eup %2412  ;;  %v1608_v11 = vadd.f32 1.0, %v2411_v3  ;;  %2414 = vpow2.f32 %v2185_v59 }
 0x595   : > { %v1627_v12 = vadd.f32 1.0, %v2413_v5 }
 0x596   : > { %2416 = vrcp.f32 %v1608_v11  ;;  %v1620_v32 = vand.u32 2147483648, %v1608_v11  ;;  %v1618_v7 = vand.u32 2147483647, %v1608_v11  ;;  %vm1614_vm5 = vweird.f32 %v1608_v11 }
 0x597   : > { %2418 = vrcp.f32 %v1627_v12  ;;  %v1586_v23 = vpop.f32.mrf.mxu2  ;;  %v1599_v24 = vpop.f32.mrf.mxu3  ;;  %v1639_v39 = vand.u32 2147483648, %v1627_v12  ;;  %v1637_v61 = vand.u32 2147483647, %v1627_v12  ;;  %vm1633_vm6 = vweird.f32 %v1627_v12 }
 0x598   : > { %v1621_v57 = vor.u32 1.1754944e-38, %v1620_v32  ;;  %vm1619_vm9 = vcmp.eq.f32.partialorder %v1618_v7, 8.507059e+37 }
 0x599   : > { %v1640_v10 = vor.u32 1.1754944e-38, %v1639_v39  ;;  %vm1638_vm10 = vcmp.eq.f32.partialorder %v1637_v61, 8.507059e+37 }
 0x59a   : > { %v2415_v28 = vpop.eup %2414 }
 0x59b   : > { %v1647_v41 = vadd.f32 1.0, %v2415_v28 }
 0x59c   : > { %v2417_v45 = vpop.eup %2416 }
 0x59d   : > { %v2419_v49 = vpop.eup %2418  ;;  %v1610_v56 = vmul.f32 %v2417_v45, %v1608_v11  ;;  %2420 = vrcp.f32 %v1647_v41  ;;  %vm1615_vm3 = vweird.f32 %v2417_v45  ;;  %v1659_v4 = vand.u32 2147483648, %v1647_v41 }
 0x59e   : > { %v1629_v51 = vmul.f32 %v2419_v49, %v1627_v12  ;;  %2422 = vtanh.f32 %v1603_v48  ;;  %vm1634_vm4 = vweird.f32 %v2419_v49  ;;  %vm1616_vm7 = vmor %vm1614_vm5, %vm1615_vm3  ;;  %vm1653_vm13 = vweird.f32 %v1647_v41 }
 0x59f   : > { %v1611_v16 = vsub.f32 1.0, %v1610_v56  ;;  %vm1635_vm8 = vmor %vm1633_vm6, %vm1634_vm4  ;;  %v1657_v8 = vand.u32 2147483647, %v1647_v41  ;;  %v1660_v13 = vor.u32 1.1754944e-38, %v1659_v4 }
 0x5a0   : > { %v1630_v60 = vsub.f32 1.0, %v1629_v51 }
 0x5a1   : > { %v1612_v50 = vmul.f32 %v2417_v45, %v1611_v16  ;;  %vm1658_vm15 = vcmp.eq.f32.partialorder %v1657_v8, 8.507059e+37 }
 0x5a2   : > { %v1631_v52 = vmul.f32 %v2419_v49, %v1630_v60 }
 0x5a3   : > { %v2421_v20 = vpop.eup %2420  ;;  %v1613_v0 = vadd.f32 %v2417_v45, %v1612_v50 }
 0x5a4   : > { %v1632_v26 = vadd.f32 %v2419_v49, %v1631_v52  ;;  %v1649_v2 = vmul.f32 %v2421_v20, %v1647_v41  ;;  %v2423_v38 = vpop.eup %2422  ;;  %vm1654_vm12 = vweird.f32 %v2421_v20 }
 0x5a5   : > { %v1617_v21 = vsel %vm1616_vm7, %v2417_v45, %v1613_v0  ;;  %vm1655_vm14 = vmor %vm1653_vm13, %vm1654_vm12 }
 0x5a6   : > { %v1622_v14 = vsel %vm1619_vm9, %v1621_v57, %v1617_v21  ;;  %v1636_v53 = vsel %vm1635_vm8, %v2419_v49, %v1632_v26  ;;  %v1650_v25 = vsub.f32 1.0, %v1649_v2 }
 0x5a7   : > { %v1641_v36 = vsel %vm1638_vm10, %v1640_v10, %v1636_v53  ;;  %v1664_v62 = vmul.f32 %v2423_v38, %v1622_v14 }
 0x5a8   : > { %v1663_v15 = vmul.f32 %v1641_v36, %v3195_v19  ;;  %v1651_v37 = vmul.f32 %v2421_v20, %v1650_v25 }
 0x5aa   : > { %v1665_v30 = vadd.f32 %v1664_v62, %v1663_v15  ;;  %v1652_v31 = vadd.f32 %v2421_v20, %v1651_v37 }
 0x5ac   : > { %2424 = vtanh.f32 %v1665_v30  ;;  %v1681_v6 = vsel %vm1675_vm11, %v1665_v30, %v3195_v19  ;;  %v1656_v44 = vsel %vm1655_vm14, %v2421_v20, %v1652_v31 }
 0x5ad   : > { %1683 = vst [vmem:[#allocation3] sm:$0xff] %v1681_v6  ;;  %v1661_v1 = vsel %vm1658_vm15, %v1660_v13, %v1656_v44 }
 0x5b2   : > { %v2425_v17 = vpop.eup %2424 }
 0x5b3   : > { %v1667_v22 = vmul.f32 %v2425_v17, %v1661_v1  ;;  %1687 = sbr.rel (%p2187_p12) target bundleno = 1466 (0x5ba), region = 40 }
 0x5b5   : > { %v1676_v29 = vsel %vm1675_vm11, %v1667_v22, 0.0  ;;  %v1680_v33 = vsel %vm1675_vm11, %v1667_v22, %v3202_v18 }
 0x5b6   : > { %1679 = vst [vmem:[%s1678_s24] sm:$0xff] %v1676_v29 }
 0x5b7   : > { %1682 = vst [vmem:[#allocation2] sm:$0xff] %v1680_v33 }
 0x5b8   : > { %1688 = vst [vmem:[%s2602_s26] sm:$0xff] %v1680_v33 }
 0x5b9   : > { %1689 = vst [vmem:[%s2607_s16] sm:$0xff] %v1681_v6 }
 0x5ba PF: > { %1704 = sbr.rel (!%p2562_p4) target bundleno = 1482 (0x5ca), region = 44  ;;  %s2236_s12 = sshll.u32 (%p2562_p4), %s2586_s7, 4 }
 0x5bb   : > { %s1711_s20 = sadd.s32 (%p2562_p4), %s2469_s21, %s2236_s12  ;;  %s3276_s3 = sld [smem:[#allocation12_spill]] (%p2562_p4) }
 0x5bc   : > { %s2192_s8 = sshll.u32 (%p2562_p4), %s1711_s20, 3 }
 0x5bf   : > { %v1756_v19 = vld [vmem:[%s2614_s11] sm:$0xff]  ;;  %v1758_v18 = vld [vmem:[%s2614_s11 + $0x8] sm:$0xff]  ;;  %v1760_v34 = vld [vmem:[%s2614_s11 + $0x10] sm:$0xff] }
 0x5c0   : > { %v1762_v35 = vld [vmem:[%s2614_s11 + $0x18] sm:$0xff]  ;;  %v1764_v40 = vld [vmem:[%s2614_s11 + $0x20] sm:$0xff]  ;;  %v1766_v42 = vld [vmem:[%s2614_s11 + $0x28] sm:$0xff] }
 0x5c1   : > { %s1713_s6 = scalar_lea.vmem %s3276_s3, %s2192_s8  ;;  %v1768_v43 = vld [vmem:[%s2614_s11 + $0x30] sm:$0xff]  ;;  %v1770_v9 = vld [vmem:[%s2614_s11 + $0x38] sm:$0xff] }
 0x5c2   : > { %1757 = vst [vmem:[%s1713_s6] sm:$0xff] %v1756_v19 }
 0x5c3   : > { %1759 = vst [vmem:[%s1713_s6 + $0x10] sm:$0xff] %v1758_v18 }
 0x5c4   : > { %1761 = vst [vmem:[%s1713_s6 + $0x20] sm:$0xff] %v1760_v34 }
 0x5c5   : > { %1763 = vst [vmem:[%s1713_s6 + $0x30] sm:$0xff] %v1762_v35 }
 0x5c6   : > { %1765 = vst [vmem:[%s1713_s6 + $0x40] sm:$0xff] %v1764_v40 }
 0x5c7   : > { %1767 = vst [vmem:[%s1713_s6 + $0x50] sm:$0xff] %v1766_v42 }
 0x5c8   : > { %1769 = vst [vmem:[%s1713_s6 + $0x60] sm:$0xff] %v1768_v43 }
 0x5c9   : > { %1771 = vst [vmem:[%s1713_s6 + $0x70] sm:$0xff] %v1770_v9 }
 0x5ca PF: > { %s3277_s21 = sld [smem:[#allocation8_spill]] }
 0x5cb   : > { %s3278_s18 = sld [smem:[#allocation5_spill]] }
 0x5cc   : > { %s3279_s19 = sld [smem:[#allocation11_spill]] }
 0x5cd   : > { %s3280_s20 = sld [smem:[#allocation6_spill]] }
 0x5ce   : > { %s3282_s22 = sld [smem:[#allocation9_spill]] }
 0x5cf   : > { %s3283_s23 = sld [smem:[#allocation10_spill]] }
 0x5d0   : > { %s16_s24 = sadd.s32 1, %s3277_s21   ;;  %s3281_s21 = sld [smem:[#allocation7_spill]] }
 0x5d1   : > { %p13_p13 = scmp.ge.s32.totalorder %s16_s24, 6  }
 0x5d3   :  { %15 = sbr.rel (!%p13_p13) target bundleno = 6 (0x6), region = 151 }

</bundles_post_ra>
